<compile_context>
chip_gen: v7x
topology: tpu7x:2x2x1
jax: 0.10.0
libtpu: 0.0.40
codegen_flags: <defaults>
</compile_context>

<pallas_src>
import functools
import math

import jax
import jax.numpy as jnp
from jax.experimental import pallas as pl
from jax.experimental.pallas import tpu as pltpu


def _round_up(x, m):
    return ((x + m - 1) // m) * m


def _fused_p6p7_kernel(x00_ref, x01_ref, x10_ref, x11_ref,
                       w6_ref, b6_ref, w7_ref, b7_ref,
                       p6_ref, p7_ref,
                       acc6_ref, acc7_ref, r6ph_ref,
                       *, ho6, wo6):
    """One grid step = `nb` whole images: p6 = conv3x3/s2(x); p7 = conv3x3/s2(relu(p6)).

    x{a}{b}_ref : (nb, Ho6p+1, Wo6p+1, Cin)  stride-2 phase (a, b) of the zero-padded input
    w6_ref      : (9, Cin,   Coutp)          per-tap p6 weights (tap = kh*3+kw), VMEM resident
    w7_ref      : (9, Coutp, Coutp)          per-tap p7 weights, VMEM resident
    b6_ref/b7_ref : (1, Coutp)               f32 biases
    p6_ref      : (nb*Ho6p*Wo6p, Coutp)      flattened p6 rows (lane dense)
    p7_ref      : (nb*Ho7*Wo6p, Coutp)       stride-1-in-W p7 rows (caller keeps every 2nd col)
    acc6/acc7   : f32 VMEM accumulators      (bound live ranges -> no vreg spills)
    r6ph_ref    : (2, nb, Ho7+1, Wpad, Coutp) relu(p6) split by row parity, zero halo
    """
    nb, hq6, wq6, cin = x00_ref.shape
    ho6p, wo6p = hq6 - 1, wq6 - 1
    coutp = p6_ref.shape[-1]
    ho7 = r6ph_ref.shape[2] - 1
    rows6 = nb * ho6p * wo6p
    rows7 = nb * ho7 * wo6p
    phases = (x00_ref, x01_ref, x10_ref, x11_ref)

    # ---- p6: 9 accumulating (rows6, Cin) x (Cin, Coutp) matmuls, one per tap ------------
    for kh in range(3):
        for kw in range(3):
            ph_ref = phases[(kh % 2) * 2 + (kw % 2)]
            dh, dw = kh // 2, kw // 2
            xs = ph_ref[:, dh:dh + ho6p, dw:dw + wo6p, :].reshape(rows6, cin)
            tap = jnp.dot(xs, w6_ref[kh * 3 + kw], preferred_element_type=jnp.float32)
            if kh == 0 and kw == 0:
                acc6_ref[...] = tap + b6_ref[...]          # bias folded into the init
            else:
                acc6_ref[...] += tap

    p6v = acc6_ref[...]
    p6_ref[...] = p6v.astype(p6_ref.dtype)

    # ---- relu(p6), applied once, staged into the zero-haloed row-parity scratch ---------
    r6 = jnp.maximum(p6v, 0.0).astype(r6ph_ref.dtype)
    r6 = r6.reshape(nb, ho7, 2, wo6p, coutp)               # trivial major-dim split (Ho6p = 2*Ho7)
    r6ph_ref[...] = jnp.zeros_like(r6ph_ref)               # halo; redone every step (megacore safe)
    r6ph_ref[0, :, 0:ho7, 1:1 + wo6p, :] = r6[:, :, 0, :, :]        # even p6 rows
    r6ph_ref[1, :, 1:1 + ho7, 1:1 + wo6p, :] = r6[:, :, 1, :, :]    # odd  p6 rows
    # Rows / columns of p6 that only exist because of the round-up are not real activations:
    # zero them so they behave exactly like conv zero padding for the p7 conv.
    if wo6p != wo6:
        r6ph_ref[:, :, :, 1 + wo6:1 + wo6p, :] = jnp.zeros(
            (2, nb, ho7 + 1, wo6p - wo6, coutp), r6ph_ref.dtype)
    if ho6p != ho6:       # Ho6 odd: the last (odd-parity) p6 row is round-up garbage
        r6ph_ref[1, :, ho7:ho7 + 1, :, :] = jnp.zeros(
            (nb, 1, r6ph_ref.shape[3], coutp), r6ph_ref.dtype)

    # ---- p7: stride-2 in H via the parity split; stride-1 in W (caller subsamples) ------
    for kh in range(3):
        part_i = 0 if kh == 1 else 1      # kh==1 reads even p6 rows, kh in {0,2} read odd rows
        roff = 1 if kh == 2 else 0
        for kw in range(3):
            xs = r6ph_ref[part_i, :, roff:roff + ho7, kw:kw + wo6p, :].reshape(rows7, coutp)
            tap = jnp.dot(xs, w7_ref[kh * 3 + kw], preferred_element_type=jnp.float32)
            if kh == 0 and kw == 0:
                acc7_ref[...] = tap + b7_ref[...]
            else:
                acc7_ref[...] += tap
    p7_ref[...] = acc7_ref[...].astype(p7_ref.dtype)


def last_level_p6p7(x_nhwc, w6, b6, w7, b7, *, compute_dtype=None, rows_per_step=None):
    """Fused P6/P7 head: p6 = conv3x3/s2/p1(x), p7 = conv3x3/s2/p1(relu(p6)). NHWC in/out."""
    N, H, W, cin = x_nhwc.shape
    cout = w6.shape[0]
    assert w6.shape == (cout, cin, 3, 3)
    assert w7.shape == (cout, cout, 3, 3)

    ho6 = (H - 1) // 2 + 1
    wo6 = (W - 1) // 2 + 1
    ho7 = (ho6 - 1) // 2 + 1
    wo7 = (wo6 - 1) // 2 + 1
    ho6p = ho6 + (ho6 % 2)           # even p6 row count -> cheap in-kernel row-parity split
    wo6p = _round_up(wo6, 8)         # sublane-aligned p6 row width
    coutp = _round_up(cout, 128)     # lane-dense output stores
    hq6, wq6 = ho6p + 1, wo6p + 1
    wpad = _round_up(wo6p + 2, 8)    # p7 input width incl. left/right zero halo

    out_dtype = x_nhwc.dtype
    op_dtype = out_dtype if compute_dtype is None else compute_dtype
    if rows_per_step is None:
        rows_per_step = 2048 if jnp.dtype(op_dtype) == jnp.dtype(jnp.bfloat16) else 1024

    # Zero-pad (top/left 1) + stride-2 phase split of the input: one cheap XLA pass,
    # no 9x im2col in HBM.  Extra bottom/right zeros only feed discarded outputs.
    xp = jnp.pad(x_nhwc, ((0, 0), (1, 2 * hq6 - 1 - H), (1, 2 * wq6 - 1 - W), (0, 0)))
    phases = [xp[:, a::2, b::2, :] for a in (0, 1) for b in (0, 1)]

    # Per-tap weight matrices, channel-padded for lane-dense MXU outputs.
    w6_t = jnp.transpose(w6, (2, 3, 1, 0)).reshape(9, cin, cout)
    w7_t = jnp.transpose(w7, (2, 3, 1, 0)).reshape(9, cout, cout)
    b6_v, b7_v = b6, b7
    if coutp != cout:
        w6_t = jnp.pad(w6_t, ((0, 0), (0, 0), (0, coutp - cout)))
        w7_t = jnp.pad(w7_t, ((0, 0), (0, coutp - cout), (0, coutp - cout)))
        b6_v = jnp.pad(b6, (0, coutp - cout))
        b7_v = jnp.pad(b7, (0, coutp - cout))
    b6_m = b6_v.reshape(1, coutp).astype(jnp.float32)
    b7_m = b7_v.reshape(1, coutp).astype(jnp.float32)
    if compute_dtype is not None:    # e.g. jnp.bfloat16 on v6e/v7x; f32 accumulation is kept
        phases = [ph.astype(op_dtype) for ph in phases]
        w6_t = w6_t.astype(op_dtype)
        w7_t = w7_t.astype(op_dtype)

    # Images per grid step: fill the MXU row block, but keep >= 2 grid steps so the
    # "parallel" axis can shard across both v7x TensorCores.
    rows_per_img = ho6p * wo6p
    budget = max(rows_per_step, rows_per_img)
    min_steps = 2 if N >= 2 else 1
    nb = 1
    for d in range(N, 0, -1):
        if N % d == 0 and d * rows_per_img <= budget and N // d >= min_steps:
            nb = d
            break
    rows6_blk = nb * rows_per_img
    rows7_blk = nb * ho7 * wo6p
    grid = (N // nb,)

    # Explicit VMEM budget (v5e default scoped limit is only 16 MiB; v7x physical is 64 MiB).
    opb = jnp.dtype(op_dtype).itemsize
    outb = jnp.dtype(out_dtype).itemsize
    est = (4 * 2 * nb * hq6 * wq6 * cin * opb               # phase blocks (double buffered)
           + 9 * (cin + coutp) * coutp * opb                # VMEM-resident weights (single copy)
           + 2 * (rows6_blk + rows7_blk) * coutp * outb     # output blocks (double buffered)
           + (rows6_blk + rows7_blk) * coutp * 4            # f32 accumulators
           + 2 * nb * (ho7 + 1) * wpad * coutp * opb        # relu(p6) staging buffer
           + 2 * rows6_blk * max(cin, coutp) * 4)           # headroom for tap-slice temporaries
    vmem_limit = int(min(max(est * 3 // 2, 32 << 20), 56 << 20))

    kernel = functools.partial(_fused_p6p7_kernel, ho6=ho6, wo6=wo6)
    phase_spec = pl.BlockSpec((nb, hq6, wq6, cin), lambda i: (i, 0, 0, 0))
    resident = pl.BlockSpec(memory_space=pltpu.MemorySpace.VMEM)   # single-buffered constants

    p6_2d, p7_2d = pl.pallas_call(
        kernel,
        out_shape=(jax.ShapeDtypeStruct((N * rows_per_img, coutp), out_dtype),
                   jax.ShapeDtypeStruct((N * ho7 * wo6p, coutp), out_dtype)),
        grid_spec=pltpu.PrefetchScalarGridSpec(
            num_scalar_prefetch=0,
            grid=grid,
            in_specs=[phase_spec, phase_spec, phase_spec, phase_spec,
                      resident, resident, resident, resident],
            out_specs=(pl.BlockSpec((rows6_blk, coutp), lambda i: (i, 0)),
                       pl.BlockSpec((rows7_blk, coutp), lambda i: (i, 0))),
            scratch_shapes=[pltpu.VMEM((rows6_blk, coutp), jnp.float32),
                            pltpu.VMEM((rows7_blk, coutp), jnp.float32),
                            pltpu.VMEM((2, nb, ho7 + 1, wpad, coutp), op_dtype)],
        ),
        compiler_params=pltpu.CompilerParams(
            dimension_semantics=("parallel",),
            vmem_limit_bytes=vmem_limit),
    )(*phases, w6_t, b6_m, w7_t, b7_m)

    p6 = p6_2d.reshape(N, ho6p, wo6p, coutp)[:, :ho6, :wo6, :cout]
    # p7 was computed at stride 1 along W; keep every 2nd column here (cheap XLA slice that
    # fuses with the NHWC->NCHW transpose).
    p7 = p7_2d.reshape(N, ho7, wo6p, coutp)[:, :, ::2, :][:, :, :wo7, :cout]
    return p6, p7


def _kaiming_uniform_conv(key, out_ch, in_ch, ksize=3):
    # nn.init.kaiming_uniform_(w, a=1): bound = sqrt(3 / fan_in); bias = 0.
    fan_in = in_ch * ksize * ksize
    bound = math.sqrt(3.0 / fan_in)
    w = jax.random.uniform(key, (out_ch, in_ch, ksize, ksize),
                           minval=-bound, maxval=bound, dtype=jnp.float32)
    b = jnp.zeros((out_ch,), dtype=jnp.float32)
    return w, b


class LastLevelP6P7:
    """JAX/Pallas port of torchvision's LastLevelP6P7 (RetinaNet P6/P7 head)."""

    def __init__(self, in_channels, out_channels, key, compute_dtype=None):
        k6, k7 = jax.random.split(key)
        self.w6, self.b6 = _kaiming_uniform_conv(k6, out_channels, in_channels)
        self.w7, self.b7 = _kaiming_uniform_conv(k7, out_channels, out_channels)
        self.use_P5 = in_channels == out_channels
        # set compute_dtype=jnp.bfloat16 on v6e/v7x for ~2x operand traffic/MXU throughput
        self.compute_dtype = compute_dtype

    def __call__(self, p, c, names):
        p5, c5 = p[-1], c[-1]
        x = p5 if self.use_P5 else c5                    # NCHW (PyTorch layout)
        x_nhwc = jnp.transpose(x, (0, 2, 3, 1))          # one NCHW->NHWC hop at the boundary
        p6_nhwc, p7_nhwc = last_level_p6p7(x_nhwc, self.w6, self.b6, self.w7, self.b7,
                                           compute_dtype=self.compute_dtype)
        p6 = jnp.transpose(p6_nhwc, (0, 3, 1, 2))
        p7 = jnp.transpose(p7_nhwc, (0, 3, 1, 2))
        p.extend([p6, p7])
        names.extend(["p6", "p7"])
        return p, names


def _ref_conv(x, w, b):
    y = jax.lax.conv_general_dilated(
        x, w, window_strides=(2, 2), padding=((1, 1), (1, 1)),
        dimension_numbers=("NCHW", "OIHW", "NCHW"),
        precision=jax.lax.Precision.HIGHEST)
    return y + b.reshape(1, -1, 1, 1)


def _check_case(key, in_channels, out_channels, H, W):
    k_mod, k_p5, k_c5 = jax.random.split(key, 3)
    block = LastLevelP6P7(in_channels, out_channels, k_mod)
    N = 2
    p5 = jax.random.normal(k_p5, (N, out_channels, H, W), dtype=jnp.float32)
    c5 = jax.random.normal(k_c5, (N, in_channels, H, W), dtype=jnp.float32)

    p, c, names = [p5], [c5], ["p5"]
    p, names = block(p, c, names)
    jax.block_until_ready(p[-1])

    x = p5 if block.use_P5 else c5
    p6_ref = _ref_conv(x, block.w6, block.b6)
    p7_ref = _ref_conv(jnp.maximum(p6_ref, 0.0), block.w7, block.b7)

    ho6, wo6 = (H - 1) // 2 + 1, (W - 1) // 2 + 1
    ho7, wo7 = (ho6 - 1) // 2 + 1, (wo6 - 1) // 2 + 1
    assert names == ["p5", "p6", "p7"]
    assert p[-2].shape == (N, out_channels, ho6, wo6)
    assert p[-1].shape == (N, out_channels, ho7, wo7)
    # Tolerance covers differing MXU f32 emulation between Mosaic and XLA's conv.
    assert jnp.allclose(p[-2], p6_ref, atol=1e-2, rtol=1e-2), "p6 mismatch"
    assert jnp.allclose(p[-1], p7_ref, atol=1e-2, rtol=1e-2), "p7 mismatch"


if __name__ == "__main__":
    key = jax.random.PRNGKey(0)
    k1, k2 = jax.random.split(key)
    _check_case(k1, 32, 32, 16, 16)   # use_P5 path, aligned spatial dims
    _check_case(k2, 24, 32, 14, 14)   # c5 path, odd p6 size exercises the halo/garbage zeroing
    print("KERNEL_OK")
</pallas_src>

<mosaic_0001>
module attributes {stable_mosaic.version = 11 : i64} {
  func.func @_fused_p6p7_kernel(%arg0: i32, %arg1: memref<1x9x9x32xf32, #tpu.memory_space<vmem>>, %arg2: memref<1x9x9x32xf32, #tpu.memory_space<vmem>>, %arg3: memref<1x9x9x32xf32, #tpu.memory_space<vmem>>, %arg4: memref<1x9x9x32xf32, #tpu.memory_space<vmem>>, %arg5: memref<9x32x128xf32, #tpu.memory_space<vmem>>, %arg6: memref<1x128xf32, #tpu.memory_space<vmem>>, %arg7: memref<9x128x128xf32, #tpu.memory_space<vmem>>, %arg8: memref<1x128xf32, #tpu.memory_space<vmem>>, %arg9: memref<64x128xf32, #tpu.memory_space<vmem>>, %arg10: memref<32x128xf32, #tpu.memory_space<vmem>>, %arg11: memref<64x128xf32, #tpu.memory_space<vmem>>, %arg12: memref<32x128xf32, #tpu.memory_space<vmem>>, %arg13: memref<2x1x5x16x128xf32, #tpu.memory_space<vmem>>) attributes {dimension_semantics = [#tpu.dimension_semantics<parallel>], iteration_bounds = array<i64: 2>, scalar_prefetch = 0 : i64, scratch_operands = 3 : i64, tpu.core_type = #tpu.core_type<tc>, window_params = [{transform_indices = @transform_0, window_bounds = array<i64: 1, 9, 9, 32>}, {transform_indices = @transform_1, window_bounds = array<i64: 1, 9, 9, 32>}, {transform_indices = @transform_2, window_bounds = array<i64: 1, 9, 9, 32>}, {transform_indices = @transform_3, window_bounds = array<i64: 1, 9, 9, 32>}, {pipeline_mode = #tpu.pipeline_mode<synchronous>, transform_indices = @transform_4, window_bounds = array<i64: 9, 32, 128>}, {pipeline_mode = #tpu.pipeline_mode<synchronous>, transform_indices = @transform_5, window_bounds = array<i64: 1, 128>}, {pipeline_mode = #tpu.pipeline_mode<synchronous>, transform_indices = @transform_6, window_bounds = array<i64: 9, 128, 128>}, {pipeline_mode = #tpu.pipeline_mode<synchronous>, transform_indices = @transform_7, window_bounds = array<i64: 1, 128>}, {transform_indices = @transform_8, window_bounds = array<i64: 64, 128>}, {transform_indices = @transform_9, window_bounds = array<i64: 32, 128>}]} {
    %c0 = arith.constant 0 : index
    %c0_0 = arith.constant 0 : index
    %c0_1 = arith.constant 0 : index
    %c0_2 = arith.constant 0 : index
    %0 = vector.load %arg1[%c0, %c0_0, %c0_1, %c0_2] : memref<1x9x9x32xf32, #tpu.memory_space<vmem>>, vector<1x8x8x32xf32>
    %1 = vector.shape_cast %0 : vector<1x8x8x32xf32> to vector<64x32xf32>
    %c0_3 = arith.constant 0 : index
    %c0_4 = arith.constant 0 : index
    %c0_5 = arith.constant 0 : index
    %2 = vector.load %arg5[%c0_3, %c0_4, %c0_5] : memref<9x32x128xf32, #tpu.memory_space<vmem>>, vector<1x32x128xf32>
    %3 = vector.shape_cast %2 : vector<1x32x128xf32> to vector<32x128xf32>
    %cst = arith.constant dense<0.000000e+00> : vector<64x128xf32>
    %4 = tpu.matmul %1, %3, %cst {dimension_numbers = #tpu.dot_dimension_numbers<[1], [0], [0], [1], [0, 0, 1, 1], [], []>} : vector<64x32xf32>, vector<32x128xf32>, vector<64x128xf32> -> vector<64x128xf32>
    %c0_6 = arith.constant 0 : index
    %c0_7 = arith.constant 0 : index
    %5 = vector.load %arg6[%c0_6, %c0_7] : memref<1x128xf32, #tpu.memory_space<vmem>>, vector<1x128xf32>
    %6 = vector.broadcast %5 : vector<1x128xf32> to vector<64x128xf32>
    %7 = arith.addf %4, %6 : vector<64x128xf32>
    %c0_8 = arith.constant 0 : index
    %c0_9 = arith.constant 0 : index
    %8 = vector.load %arg11[%c0_8, %c0_9] : memref<64x128xf32, #tpu.memory_space<vmem>>, vector<64x128xf32>
    tpu.vector_store %arg11[%c0_8, %c0_9], %7 {strides = array<i32>} : memref<64x128xf32, #tpu.memory_space<vmem>>, vector<64x128xf32>,
    %c0_10 = arith.constant 0 : index
    %c0_11 = arith.constant 0 : index
    %c0_12 = arith.constant 0 : index
    %c0_13 = arith.constant 0 : index
    %9 = vector.load %arg2[%c0_10, %c0_11, %c0_12, %c0_13] : memref<1x9x9x32xf32, #tpu.memory_space<vmem>>, vector<1x8x8x32xf32>
    %10 = vector.shape_cast %9 : vector<1x8x8x32xf32> to vector<64x32xf32>
    %c1 = arith.constant 1 : index
    %c0_14 = arith.constant 0 : index
    %c0_15 = arith.constant 0 : index
    %11 = vector.load %arg5[%c1, %c0_14, %c0_15] : memref<9x32x128xf32, #tpu.memory_space<vmem>>, vector<1x32x128xf32>
    %12 = vector.shape_cast %11 : vector<1x32x128xf32> to vector<32x128xf32>
    %cst_16 = arith.constant dense<0.000000e+00> : vector<64x128xf32>
    %13 = tpu.matmul %10, %12, %cst_16 {dimension_numbers = #tpu.dot_dimension_numbers<[1], [0], [0], [1], [0, 0, 1, 1], [], []>} : vector<64x32xf32>, vector<32x128xf32>, vector<64x128xf32> -> vector<64x128xf32>
    %c0_17 = arith.constant 0 : index
    %c0_18 = arith.constant 0 : index
    %14 = vector.load %arg11[%c0_17, %c0_18] : memref<64x128xf32, #tpu.memory_space<vmem>>, vector<64x128xf32>
    %15 = arith.addf %14, %13 : vector<64x128xf32>
    %c0_19 = arith.constant 0 : index
    %c0_20 = arith.constant 0 : index
    %16 = vector.load %arg11[%c0_19, %c0_20] : memref<64x128xf32, #tpu.memory_space<vmem>>, vector<64x128xf32>
    tpu.vector_store %arg11[%c0_19, %c0_20], %15 {strides = array<i32>} : memref<64x128xf32, #tpu.memory_space<vmem>>, vector<64x128xf32>,
    %c0_21 = arith.constant 0 : index
    %c0_22 = arith.constant 0 : index
    %c1_23 = arith.constant 1 : index
    %c0_24 = arith.constant 0 : index
    %17 = vector.load %arg1[%c0_21, %c0_22, %c1_23, %c0_24] : memref<1x9x9x32xf32, #tpu.memory_space<vmem>>, vector<1x8x8x32xf32>
    %18 = vector.shape_cast %17 : vector<1x8x8x32xf32> to vector<64x32xf32>
    %c2 = arith.constant 2 : index
    %c0_25 = arith.constant 0 : index
    %c0_26 = arith.constant 0 : index
    %19 = vector.load %arg5[%c2, %c0_25, %c0_26] : memref<9x32x128xf32, #tpu.memory_space<vmem>>, vector<1x32x128xf32>
    %20 = vector.shape_cast %19 : vector<1x32x128xf32> to vector<32x128xf32>
    %cst_27 = arith.constant dense<0.000000e+00> : vector<64x128xf32>
    %21 = tpu.matmul %18, %20, %cst_27 {dimension_numbers = #tpu.dot_dimension_numbers<[1], [0], [0], [1], [0, 0, 1, 1], [], []>} : vector<64x32xf32>, vector<32x128xf32>, vector<64x128xf32> -> vector<64x128xf32>
    %c0_28 = arith.constant 0 : index
    %c0_29 = arith.constant 0 : index
    %22 = vector.load %arg11[%c0_28, %c0_29] : memref<64x128xf32, #tpu.memory_space<vmem>>, vector<64x128xf32>
    %23 = arith.addf %22, %21 : vector<64x128xf32>
    %c0_30 = arith.constant 0 : index
    %c0_31 = arith.constant 0 : index
    %24 = vector.load %arg11[%c0_30, %c0_31] : memref<64x128xf32, #tpu.memory_space<vmem>>, vector<64x128xf32>
    tpu.vector_store %arg11[%c0_30, %c0_31], %23 {strides = array<i32>} : memref<64x128xf32, #tpu.memory_space<vmem>>, vector<64x128xf32>,
    %c0_32 = arith.constant 0 : index
    %c0_33 = arith.constant 0 : index
    %c0_34 = arith.constant 0 : index
    %c0_35 = arith.constant 0 : index
    %25 = vector.load %arg3[%c0_32, %c0_33, %c0_34, %c0_35] : memref<1x9x9x32xf32, #tpu.memory_space<vmem>>, vector<1x8x8x32xf32>
    %26 = vector.shape_cast %25 : vector<1x8x8x32xf32> to vector<64x32xf32>
    %c3 = arith.constant 3 : index
    %c0_36 = arith.constant 0 : index
    %c0_37 = arith.constant 0 : index
    %27 = vector.load %arg5[%c3, %c0_36, %c0_37] : memref<9x32x128xf32, #tpu.memory_space<vmem>>, vector<1x32x128xf32>
    %28 = vector.shape_cast %27 : vector<1x32x128xf32> to vector<32x128xf32>
    %cst_38 = arith.constant dense<0.000000e+00> : vector<64x128xf32>
    %29 = tpu.matmul %26, %28, %cst_38 {dimension_numbers = #tpu.dot_dimension_numbers<[1], [0], [0], [1], [0, 0, 1, 1], [], []>} : vector<64x32xf32>, vector<32x128xf32>, vector<64x128xf32> -> vector<64x128xf32>
    %c0_39 = arith.constant 0 : index
    %c0_40 = arith.constant 0 : index
    %30 = vector.load %arg11[%c0_39, %c0_40] : memref<64x128xf32, #tpu.memory_space<vmem>>, vector<64x128xf32>
    %31 = arith.addf %30, %29 : vector<64x128xf32>
    %c0_41 = arith.constant 0 : index
    %c0_42 = arith.constant 0 : index
    %32 = vector.load %arg11[%c0_41, %c0_42] : memref<64x128xf32, #tpu.memory_space<vmem>>, vector<64x128xf32>
    tpu.vector_store %arg11[%c0_41, %c0_42], %31 {strides = array<i32>} : memref<64x128xf32, #tpu.memory_space<vmem>>, vector<64x128xf32>,
    %c0_43 = arith.constant 0 : index
    %c0_44 = arith.constant 0 : index
    %c0_45 = arith.constant 0 : index
    %c0_46 = arith.constant 0 : index
    %33 = vector.load %arg4[%c0_43, %c0_44, %c0_45, %c0_46] : memref<1x9x9x32xf32, #tpu.memory_space<vmem>>, vector<1x8x8x32xf32>
    %34 = vector.shape_cast %33 : vector<1x8x8x32xf32> to vector<64x32xf32>
    %c4 = arith.constant 4 : index
    %c0_47 = arith.constant 0 : index
    %c0_48 = arith.constant 0 : index
    %35 = vector.load %arg5[%c4, %c0_47, %c0_48] : memref<9x32x128xf32, #tpu.memory_space<vmem>>, vector<1x32x128xf32>
    %36 = vector.shape_cast %35 : vector<1x32x128xf32> to vector<32x128xf32>
    %cst_49 = arith.constant dense<0.000000e+00> : vector<64x128xf32>
    %37 = tpu.matmul %34, %36, %cst_49 {dimension_numbers = #tpu.dot_dimension_numbers<[1], [0], [0], [1], [0, 0, 1, 1], [], []>} : vector<64x32xf32>, vector<32x128xf32>, vector<64x128xf32> -> vector<64x128xf32>
    %c0_50 = arith.constant 0 : index
    %c0_51 = arith.constant 0 : index
    %38 = vector.load %arg11[%c0_50, %c0_51] : memref<64x128xf32, #tpu.memory_space<vmem>>, vector<64x128xf32>
    %39 = arith.addf %38, %37 : vector<64x128xf32>
    %c0_52 = arith.constant 0 : index
    %c0_53 = arith.constant 0 : index
    %40 = vector.load %arg11[%c0_52, %c0_53] : memref<64x128xf32, #tpu.memory_space<vmem>>, vector<64x128xf32>
    tpu.vector_store %arg11[%c0_52, %c0_53], %39 {strides = array<i32>} : memref<64x128xf32, #tpu.memory_space<vmem>>, vector<64x128xf32>,
    %c0_54 = arith.constant 0 : index
    %c0_55 = arith.constant 0 : index
    %c1_56 = arith.constant 1 : index
    %c0_57 = arith.constant 0 : index
    %41 = vector.load %arg3[%c0_54, %c0_55, %c1_56, %c0_57] : memref<1x9x9x32xf32, #tpu.memory_space<vmem>>, vector<1x8x8x32xf32>
    %42 = vector.shape_cast %41 : vector<1x8x8x32xf32> to vector<64x32xf32>
    %c5 = arith.constant 5 : index
    %c0_58 = arith.constant 0 : index
    %c0_59 = arith.constant 0 : index
    %43 = vector.load %arg5[%c5, %c0_58, %c0_59] : memref<9x32x128xf32, #tpu.memory_space<vmem>>, vector<1x32x128xf32>
    %44 = vector.shape_cast %43 : vector<1x32x128xf32> to vector<32x128xf32>
    %cst_60 = arith.constant dense<0.000000e+00> : vector<64x128xf32>
    %45 = tpu.matmul %42, %44, %cst_60 {dimension_numbers = #tpu.dot_dimension_numbers<[1], [0], [0], [1], [0, 0, 1, 1], [], []>} : vector<64x32xf32>, vector<32x128xf32>, vector<64x128xf32> -> vector<64x128xf32>
    %c0_61 = arith.constant 0 : index
    %c0_62 = arith.constant 0 : index
    %46 = vector.load %arg11[%c0_61, %c0_62] : memref<64x128xf32, #tpu.memory_space<vmem>>, vector<64x128xf32>
    %47 = arith.addf %46, %45 : vector<64x128xf32>
    %c0_63 = arith.constant 0 : index
    %c0_64 = arith.constant 0 : index
    %48 = vector.load %arg11[%c0_63, %c0_64] : memref<64x128xf32, #tpu.memory_space<vmem>>, vector<64x128xf32>
    tpu.vector_store %arg11[%c0_63, %c0_64], %47 {strides = array<i32>} : memref<64x128xf32, #tpu.memory_space<vmem>>, vector<64x128xf32>,
    %c0_65 = arith.constant 0 : index
    %c1_66 = arith.constant 1 : index
    %c0_67 = arith.constant 0 : index
    %c0_68 = arith.constant 0 : index
    %49 = vector.load %arg1[%c0_65, %c1_66, %c0_67, %c0_68] : memref<1x9x9x32xf32, #tpu.memory_space<vmem>>, vector<1x8x8x32xf32>
    %50 = vector.shape_cast %49 : vector<1x8x8x32xf32> to vector<64x32xf32>
    %c6 = arith.constant 6 : index
    %c0_69 = arith.constant 0 : index
    %c0_70 = arith.constant 0 : index
    %51 = vector.load %arg5[%c6, %c0_69, %c0_70] : memref<9x32x128xf32, #tpu.memory_space<vmem>>, vector<1x32x128xf32>
    %52 = vector.shape_cast %51 : vector<1x32x128xf32> to vector<32x128xf32>
    %cst_71 = arith.constant dense<0.000000e+00> : vector<64x128xf32>
    %53 = tpu.matmul %50, %52, %cst_71 {dimension_numbers = #tpu.dot_dimension_numbers<[1], [0], [0], [1], [0, 0, 1, 1], [], []>} : vector<64x32xf32>, vector<32x128xf32>, vector<64x128xf32> -> vector<64x128xf32>
    %c0_72 = arith.constant 0 : index
    %c0_73 = arith.constant 0 : index
    %54 = vector.load %arg11[%c0_72, %c0_73] : memref<64x128xf32, #tpu.memory_space<vmem>>, vector<64x128xf32>
    %55 = arith.addf %54, %53 : vector<64x128xf32>
    %c0_74 = arith.constant 0 : index
    %c0_75 = arith.constant 0 : index
    %56 = vector.load %arg11[%c0_74, %c0_75] : memref<64x128xf32, #tpu.memory_space<vmem>>, vector<64x128xf32>
    tpu.vector_store %arg11[%c0_74, %c0_75], %55 {strides = array<i32>} : memref<64x128xf32, #tpu.memory_space<vmem>>, vector<64x128xf32>,
    %c0_76 = arith.constant 0 : index
    %c1_77 = arith.constant 1 : index
    %c0_78 = arith.constant 0 : index
    %c0_79 = arith.constant 0 : index
    %57 = vector.load %arg2[%c0_76, %c1_77, %c0_78, %c0_79] : memref<1x9x9x32xf32, #tpu.memory_space<vmem>>, vector<1x8x8x32xf32>
    %58 = vector.shape_cast %57 : vector<1x8x8x32xf32> to vector<64x32xf32>
    %c7 = arith.constant 7 : index
    %c0_80 = arith.constant 0 : index
    %c0_81 = arith.constant 0 : index
    %59 = vector.load %arg5[%c7, %c0_80, %c0_81] : memref<9x32x128xf32, #tpu.memory_space<vmem>>, vector<1x32x128xf32>
    %60 = vector.shape_cast %59 : vector<1x32x128xf32> to vector<32x128xf32>
    %cst_82 = arith.constant dense<0.000000e+00> : vector<64x128xf32>
    %61 = tpu.matmul %58, %60, %cst_82 {dimension_numbers = #tpu.dot_dimension_numbers<[1], [0], [0], [1], [0, 0, 1, 1], [], []>} : vector<64x32xf32>, vector<32x128xf32>, vector<64x128xf32> -> vector<64x128xf32>
    %c0_83 = arith.constant 0 : index
    %c0_84 = arith.constant 0 : index
    %62 = vector.load %arg11[%c0_83, %c0_84] : memref<64x128xf32, #tpu.memory_space<vmem>>, vector<64x128xf32>
    %63 = arith.addf %62, %61 : vector<64x128xf32>
    %c0_85 = arith.constant 0 : index
    %c0_86 = arith.constant 0 : index
    %64 = vector.load %arg11[%c0_85, %c0_86] : memref<64x128xf32, #tpu.memory_space<vmem>>, vector<64x128xf32>
    tpu.vector_store %arg11[%c0_85, %c0_86], %63 {strides = array<i32>} : memref<64x128xf32, #tpu.memory_space<vmem>>, vector<64x128xf32>,
    %c0_87 = arith.constant 0 : index
    %c1_88 = arith.constant 1 : index
    %c1_89 = arith.constant 1 : index
    %c0_90 = arith.constant 0 : index
    %65 = vector.load %arg1[%c0_87, %c1_88, %c1_89, %c0_90] : memref<1x9x9x32xf32, #tpu.memory_space<vmem>>, vector<1x8x8x32xf32>
    %66 = vector.shape_cast %65 : vector<1x8x8x32xf32> to vector<64x32xf32>
    %c8 = arith.constant 8 : index
    %c0_91 = arith.constant 0 : index
    %c0_92 = arith.constant 0 : index
    %67 = vector.load %arg5[%c8, %c0_91, %c0_92] : memref<9x32x128xf32, #tpu.memory_space<vmem>>, vector<1x32x128xf32>
    %68 = vector.shape_cast %67 : vector<1x32x128xf32> to vector<32x128xf32>
    %cst_93 = arith.constant dense<0.000000e+00> : vector<64x128xf32>
    %69 = tpu.matmul %66, %68, %cst_93 {dimension_numbers = #tpu.dot_dimension_numbers<[1], [0], [0], [1], [0, 0, 1, 1], [], []>} : vector<64x32xf32>, vector<32x128xf32>, vector<64x128xf32> -> vector<64x128xf32>
    %c0_94 = arith.constant 0 : index
    %c0_95 = arith.constant 0 : index
    %70 = vector.load %arg11[%c0_94, %c0_95] : memref<64x128xf32, #tpu.memory_space<vmem>>, vector<64x128xf32>
    %71 = arith.addf %70, %69 : vector<64x128xf32>
    %c0_96 = arith.constant 0 : index
    %c0_97 = arith.constant 0 : index
    %72 = vector.load %arg11[%c0_96, %c0_97] : memref<64x128xf32, #tpu.memory_space<vmem>>, vector<64x128xf32>
    tpu.vector_store %arg11[%c0_96, %c0_97], %71 {strides = array<i32>} : memref<64x128xf32, #tpu.memory_space<vmem>>, vector<64x128xf32>,
    %c0_98 = arith.constant 0 : index
    %c0_99 = arith.constant 0 : index
    %73 = vector.load %arg11[%c0_98, %c0_99] : memref<64x128xf32, #tpu.memory_space<vmem>>, vector<64x128xf32>
    %c0_100 = arith.constant 0 : index
    %c0_101 = arith.constant 0 : index
    %74 = vector.load %arg9[%c0_100, %c0_101] : memref<64x128xf32, #tpu.memory_space<vmem>>, vector<64x128xf32>
    tpu.vector_store %arg9[%c0_100, %c0_101], %73 {strides = array<i32>} : memref<64x128xf32, #tpu.memory_space<vmem>>, vector<64x128xf32>,
    %cst_102 = arith.constant 0.000000e+00 : f32
    %75 = vector.broadcast %cst_102 : f32 to vector<64x128xf32>
    %76 = arith.maximumf %73, %75 : vector<64x128xf32>
    %77 = vector.shape_cast %76 : vector<64x128xf32> to vector<1x4x2x8x128xf32>
    %cst_103 = arith.constant 0.000000e+00 : f32
    %78 = vector.broadcast %cst_103 : f32 to vector<2x1x5x16x128xf32>
    %c0_104 = arith.constant 0 : index
    %c0_105 = arith.constant 0 : index
    %c0_106 = arith.constant 0 : index
    %c0_107 = arith.constant 0 : index
    %c0_108 = arith.constant 0 : index
    %79 = vector.load %arg13[%c0_104, %c0_105, %c0_106, %c0_107, %c0_108] : memref<2x1x5x16x128xf32, #tpu.memory_space<vmem>>, vector<2x1x5x16x128xf32>
    tpu.vector_store %arg13[%c0_104, %c0_105, %c0_106, %c0_107, %c0_108], %78 {strides = array<i32>} : memref<2x1x5x16x128xf32, #tpu.memory_space<vmem>>, vector<2x1x5x16x128xf32>,
    %80 = vector.extract_strided_slice %77 {offsets = [0, 0, 0, 0, 0], sizes = [1, 4, 1, 8, 128], strides = [1, 1, 1, 1, 1]} : vector<1x4x2x8x128xf32> to vector<1x4x1x8x128xf32>
    %81 = vector.shape_cast %80 : vector<1x4x1x8x128xf32> to vector<1x4x8x128xf32>
    %c0_109 = arith.constant 0 : index
    %c0_110 = arith.constant 0 : index
    %c0_111 = arith.constant 0 : index
    %c1_112 = arith.constant 1 : index
    %c0_113 = arith.constant 0 : index
    %82 = vector.load %arg13[%c0_109, %c0_110, %c0_111, %c1_112, %c0_113] : memref<2x1x5x16x128xf32, #tpu.memory_space<vmem>>, vector<1x1x4x8x128xf32>
    %83 = vector.shape_cast %82 : vector<1x1x4x8x128xf32> to vector<1x4x8x128xf32>
    %84 = vector.shape_cast %81 : vector<1x4x8x128xf32> to vector<1x1x4x8x128xf32>
    tpu.vector_store %arg13[%c0_109, %c0_110, %c0_111, %c1_112, %c0_113], %84 {strides = array<i32>} : memref<2x1x5x16x128xf32, #tpu.memory_space<vmem>>, vector<1x1x4x8x128xf32>,
    %85 = vector.extract_strided_slice %77 {offsets = [0, 0, 1, 0, 0], sizes = [1, 4, 1, 8, 128], strides = [1, 1, 1, 1, 1]} : vector<1x4x2x8x128xf32> to vector<1x4x1x8x128xf32>
    %86 = vector.shape_cast %85 : vector<1x4x1x8x128xf32> to vector<1x4x8x128xf32>
    %c1_114 = arith.constant 1 : index
    %c0_115 = arith.constant 0 : index
    %c1_116 = arith.constant 1 : index
    %c1_117 = arith.constant 1 : index
    %c0_118 = arith.constant 0 : index
    %87 = vector.load %arg13[%c1_114, %c0_115, %c1_116, %c1_117, %c0_118] : memref<2x1x5x16x128xf32, #tpu.memory_space<vmem>>, vector<1x1x4x8x128xf32>
    %88 = vector.shape_cast %87 : vector<1x1x4x8x128xf32> to vector<1x4x8x128xf32>
    %89 = vector.shape_cast %86 : vector<1x4x8x128xf32> to vector<1x1x4x8x128xf32>
    tpu.vector_store %arg13[%c1_114, %c0_115, %c1_116, %c1_117, %c0_118], %89 {strides = array<i32>} : memref<2x1x5x16x128xf32, #tpu.memory_space<vmem>>, vector<1x1x4x8x128xf32>,
    %c1_119 = arith.constant 1 : index
    %c0_120 = arith.constant 0 : index
    %c0_121 = arith.constant 0 : index
    %c0_122 = arith.constant 0 : index
    %c0_123 = arith.constant 0 : index
    %90 = vector.load %arg13[%c1_119, %c0_120, %c0_121, %c0_122, %c0_123] : memref<2x1x5x16x128xf32, #tpu.memory_space<vmem>>, vector<1x1x4x8x128xf32>
    %91 = vector.shape_cast %90 : vector<1x1x4x8x128xf32> to vector<1x4x8x128xf32>
    %92 = vector.shape_cast %91 : vector<1x4x8x128xf32> to vector<32x128xf32>
    %c0_124 = arith.constant 0 : index
    %c0_125 = arith.constant 0 : index
    %c0_126 = arith.constant 0 : index
    %93 = vector.load %arg7[%c0_124, %c0_125, %c0_126] : memref<9x128x128xf32, #tpu.memory_space<vmem>>, vector<1x128x128xf32>
    %94 = vector.shape_cast %93 : vector<1x128x128xf32> to vector<128x128xf32>
    %cst_127 = arith.constant dense<0.000000e+00> : vector<32x128xf32>
    %95 = tpu.matmul %92, %94, %cst_127 {dimension_numbers = #tpu.dot_dimension_numbers<[1], [0], [0], [1], [0, 0, 1, 1], [], []>} : vector<32x128xf32>, vector<128x128xf32>, vector<32x128xf32> -> vector<32x128xf32>
    %c0_128 = arith.constant 0 : index
    %c0_129 = arith.constant 0 : index
    %96 = vector.load %arg8[%c0_128, %c0_129] : memref<1x128xf32, #tpu.memory_space<vmem>>, vector<1x128xf32>
    %97 = vector.broadcast %96 : vector<1x128xf32> to vector<32x128xf32>
    %98 = arith.addf %95, %97 : vector<32x128xf32>
    %c0_130 = arith.constant 0 : index
    %c0_131 = arith.constant 0 : index
    %99 = vector.load %arg12[%c0_130, %c0_131] : memref<32x128xf32, #tpu.memory_space<vmem>>, vector<32x128xf32>
    tpu.vector_store %arg12[%c0_130, %c0_131], %98 {strides = array<i32>} : memref<32x128xf32, #tpu.memory_space<vmem>>, vector<32x128xf32>,
    %c1_132 = arith.constant 1 : index
    %c0_133 = arith.constant 0 : index
    %c0_134 = arith.constant 0 : index
    %c1_135 = arith.constant 1 : index
    %c0_136 = arith.constant 0 : index
    %100 = vector.load %arg13[%c1_132, %c0_133, %c0_134, %c1_135, %c0_136] : memref<2x1x5x16x128xf32, #tpu.memory_space<vmem>>, vector<1x1x4x8x128xf32>
    %101 = vector.shape_cast %100 : vector<1x1x4x8x128xf32> to vector<1x4x8x128xf32>
    %102 = vector.shape_cast %101 : vector<1x4x8x128xf32> to vector<32x128xf32>
    %c1_137 = arith.constant 1 : index
    %c0_138 = arith.constant 0 : index
    %c0_139 = arith.constant 0 : index
    %103 = vector.load %arg7[%c1_137, %c0_138, %c0_139] : memref<9x128x128xf32, #tpu.memory_space<vmem>>, vector<1x128x128xf32>
    %104 = vector.shape_cast %103 : vector<1x128x128xf32> to vector<128x128xf32>
    %cst_140 = arith.constant dense<0.000000e+00> : vector<32x128xf32>
    %105 = tpu.matmul %102, %104, %cst_140 {dimension_numbers = #tpu.dot_dimension_numbers<[1], [0], [0], [1], [0, 0, 1, 1], [], []>} : vector<32x128xf32>, vector<128x128xf32>, vector<32x128xf32> -> vector<32x128xf32>
    %c0_141 = arith.constant 0 : index
    %c0_142 = arith.constant 0 : index
    %106 = vector.load %arg12[%c0_141, %c0_142] : memref<32x128xf32, #tpu.memory_space<vmem>>, vector<32x128xf32>
    %107 = arith.addf %106, %105 : vector<32x128xf32>
    %c0_143 = arith.constant 0 : index
    %c0_144 = arith.constant 0 : index
    %108 = vector.load %arg12[%c0_143, %c0_144] : memref<32x128xf32, #tpu.memory_space<vmem>>, vector<32x128xf32>
    tpu.vector_store %arg12[%c0_143, %c0_144], %107 {strides = array<i32>} : memref<32x128xf32, #tpu.memory_space<vmem>>, vector<32x128xf32>,
    %c1_145 = arith.constant 1 : index
    %c0_146 = arith.constant 0 : index
    %c0_147 = arith.constant 0 : index
    %c2_148 = arith.constant 2 : index
    %c0_149 = arith.constant 0 : index
    %109 = vector.load %arg13[%c1_145, %c0_146, %c0_147, %c2_148, %c0_149] : memref<2x1x5x16x128xf32, #tpu.memory_space<vmem>>, vector<1x1x4x8x128xf32>
    %110 = vector.shape_cast %109 : vector<1x1x4x8x128xf32> to vector<1x4x8x128xf32>
    %111 = vector.shape_cast %110 : vector<1x4x8x128xf32> to vector<32x128xf32>
    %c2_150 = arith.constant 2 : index
    %c0_151 = arith.constant 0 : index
    %c0_152 = arith.constant 0 : index
    %112 = vector.load %arg7[%c2_150, %c0_151, %c0_152] : memref<9x128x128xf32, #tpu.memory_space<vmem>>, vector<1x128x128xf32>
    %113 = vector.shape_cast %112 : vector<1x128x128xf32> to vector<128x128xf32>
    %cst_153 = arith.constant dense<0.000000e+00> : vector<32x128xf32>
    %114 = tpu.matmul %111, %113, %cst_153 {dimension_numbers = #tpu.dot_dimension_numbers<[1], [0], [0], [1], [0, 0, 1, 1], [], []>} : vector<32x128xf32>, vector<128x128xf32>, vector<32x128xf32> -> vector<32x128xf32>
    %c0_154 = arith.constant 0 : index
    %c0_155 = arith.constant 0 : index
    %115 = vector.load %arg12[%c0_154, %c0_155] : memref<32x128xf32, #tpu.memory_space<vmem>>, vector<32x128xf32>
    %116 = arith.addf %115, %114 : vector<32x128xf32>
    %c0_156 = arith.constant 0 : index
    %c0_157 = arith.constant 0 : index
    %117 = vector.load %arg12[%c0_156, %c0_157] : memref<32x128xf32, #tpu.memory_space<vmem>>, vector<32x128xf32>
    tpu.vector_store %arg12[%c0_156, %c0_157], %116 {strides = array<i32>} : memref<32x128xf32, #tpu.memory_space<vmem>>, vector<32x128xf32>,
    %c0_158 = arith.constant 0 : index
    %c0_159 = arith.constant 0 : index
    %c0_160 = arith.constant 0 : index
    %c0_161 = arith.constant 0 : index
    %c0_162 = arith.constant 0 : index
    %118 = vector.load %arg13[%c0_158, %c0_159, %c0_160, %c0_161, %c0_162] : memref<2x1x5x16x128xf32, #tpu.memory_space<vmem>>, vector<1x1x4x8x128xf32>
    %119 = vector.shape_cast %118 : vector<1x1x4x8x128xf32> to vector<1x4x8x128xf32>
    %120 = vector.shape_cast %119 : vector<1x4x8x128xf32> to vector<32x128xf32>
    %c3_163 = arith.constant 3 : index
    %c0_164 = arith.constant 0 : index
    %c0_165 = arith.constant 0 : index
    %121 = vector.load %arg7[%c3_163, %c0_164, %c0_165] : memref<9x128x128xf32, #tpu.memory_space<vmem>>, vector<1x128x128xf32>
    %122 = vector.shape_cast %121 : vector<1x128x128xf32> to vector<128x128xf32>
    %cst_166 = arith.constant dense<0.000000e+00> : vector<32x128xf32>
    %123 = tpu.matmul %120, %122, %cst_166 {dimension_numbers = #tpu.dot_dimension_numbers<[1], [0], [0], [1], [0, 0, 1, 1], [], []>} : vector<32x128xf32>, vector<128x128xf32>, vector<32x128xf32> -> vector<32x128xf32>
    %c0_167 = arith.constant 0 : index
    %c0_168 = arith.constant 0 : index
    %124 = vector.load %arg12[%c0_167, %c0_168] : memref<32x128xf32, #tpu.memory_space<vmem>>, vector<32x128xf32>
    %125 = arith.addf %124, %123 : vector<32x128xf32>
    %c0_169 = arith.constant 0 : index
    %c0_170 = arith.constant 0 : index
    %126 = vector.load %arg12[%c0_169, %c0_170] : memref<32x128xf32, #tpu.memory_space<vmem>>, vector<32x128xf32>
    tpu.vector_store %arg12[%c0_169, %c0_170], %125 {strides = array<i32>} : memref<32x128xf32, #tpu.memory_space<vmem>>, vector<32x128xf32>,
    %c0_171 = arith.constant 0 : index
    %c0_172 = arith.constant 0 : index
    %c0_173 = arith.constant 0 : index
    %c1_174 = arith.constant 1 : index
    %c0_175 = arith.constant 0 : index
    %127 = vector.load %arg13[%c0_171, %c0_172, %c0_173, %c1_174, %c0_175] : memref<2x1x5x16x128xf32, #tpu.memory_space<vmem>>, vector<1x1x4x8x128xf32>
    %128 = vector.shape_cast %127 : vector<1x1x4x8x128xf32> to vector<1x4x8x128xf32>
    %129 = vector.shape_cast %128 : vector<1x4x8x128xf32> to vector<32x128xf32>
    %c4_176 = arith.constant 4 : index
    %c0_177 = arith.constant 0 : index
    %c0_178 = arith.constant 0 : index
    %130 = vector.load %arg7[%c4_176, %c0_177, %c0_178] : memref<9x128x128xf32, #tpu.memory_space<vmem>>, vector<1x128x128xf32>
    %131 = vector.shape_cast %130 : vector<1x128x128xf32> to vector<128x128xf32>
    %cst_179 = arith.constant dense<0.000000e+00> : vector<32x128xf32>
    %132 = tpu.matmul %129, %131, %cst_179 {dimension_numbers = #tpu.dot_dimension_numbers<[1], [0], [0], [1], [0, 0, 1, 1], [], []>} : vector<32x128xf32>, vector<128x128xf32>, vector<32x128xf32> -> vector<32x128xf32>
    %c0_180 = arith.constant 0 : index
    %c0_181 = arith.constant 0 : index
    %133 = vector.load %arg12[%c0_180, %c0_181] : memref<32x128xf32, #tpu.memory_space<vmem>>, vector<32x128xf32>
    %134 = arith.addf %133, %132 : vector<32x128xf32>
    %c0_182 = arith.constant 0 : index
    %c0_183 = arith.constant 0 : index
    %135 = vector.load %arg12[%c0_182, %c0_183] : memref<32x128xf32, #tpu.memory_space<vmem>>, vector<32x128xf32>
    tpu.vector_store %arg12[%c0_182, %c0_183], %134 {strides = array<i32>} : memref<32x128xf32, #tpu.memory_space<vmem>>, vector<32x128xf32>,
    %c0_184 = arith.constant 0 : index
    %c0_185 = arith.constant 0 : index
    %c0_186 = arith.constant 0 : index
    %c2_187 = arith.constant 2 : index
    %c0_188 = arith.constant 0 : index
    %136 = vector.load %arg13[%c0_184, %c0_185, %c0_186, %c2_187, %c0_188] : memref<2x1x5x16x128xf32, #tpu.memory_space<vmem>>, vector<1x1x4x8x128xf32>
    %137 = vector.shape_cast %136 : vector<1x1x4x8x128xf32> to vector<1x4x8x128xf32>
    %138 = vector.shape_cast %137 : vector<1x4x8x128xf32> to vector<32x128xf32>
    %c5_189 = arith.constant 5 : index
    %c0_190 = arith.constant 0 : index
    %c0_191 = arith.constant 0 : index
    %139 = vector.load %arg7[%c5_189, %c0_190, %c0_191] : memref<9x128x128xf32, #tpu.memory_space<vmem>>, vector<1x128x128xf32>
    %140 = vector.shape_cast %139 : vector<1x128x128xf32> to vector<128x128xf32>
    %cst_192 = arith.constant dense<0.000000e+00> : vector<32x128xf32>
    %141 = tpu.matmul %138, %140, %cst_192 {dimension_numbers = #tpu.dot_dimension_numbers<[1], [0], [0], [1], [0, 0, 1, 1], [], []>} : vector<32x128xf32>, vector<128x128xf32>, vector<32x128xf32> -> vector<32x128xf32>
    %c0_193 = arith.constant 0 : index
    %c0_194 = arith.constant 0 : index
    %142 = vector.load %arg12[%c0_193, %c0_194] : memref<32x128xf32, #tpu.memory_space<vmem>>, vector<32x128xf32>
    %143 = arith.addf %142, %141 : vector<32x128xf32>
    %c0_195 = arith.constant 0 : index
    %c0_196 = arith.constant 0 : index
    %144 = vector.load %arg12[%c0_195, %c0_196] : memref<32x128xf32, #tpu.memory_space<vmem>>, vector<32x128xf32>
    tpu.vector_store %arg12[%c0_195, %c0_196], %143 {strides = array<i32>} : memref<32x128xf32, #tpu.memory_space<vmem>>, vector<32x128xf32>,
    %c1_197 = arith.constant 1 : index
    %c0_198 = arith.constant 0 : index
    %c1_199 = arith.constant 1 : index
    %c0_200 = arith.constant 0 : index
    %c0_201 = arith.constant 0 : index
    %145 = vector.load %arg13[%c1_197, %c0_198, %c1_199, %c0_200, %c0_201] : memref<2x1x5x16x128xf32, #tpu.memory_space<vmem>>, vector<1x1x4x8x128xf32>
    %146 = vector.shape_cast %145 : vector<1x1x4x8x128xf32> to vector<1x4x8x128xf32>
    %147 = vector.shape_cast %146 : vector<1x4x8x128xf32> to vector<32x128xf32>
    %c6_202 = arith.constant 6 : index
    %c0_203 = arith.constant 0 : index
    %c0_204 = arith.constant 0 : index
    %148 = vector.load %arg7[%c6_202, %c0_203, %c0_204] : memref<9x128x128xf32, #tpu.memory_space<vmem>>, vector<1x128x128xf32>
    %149 = vector.shape_cast %148 : vector<1x128x128xf32> to vector<128x128xf32>
    %cst_205 = arith.constant dense<0.000000e+00> : vector<32x128xf32>
    %150 = tpu.matmul %147, %149, %cst_205 {dimension_numbers = #tpu.dot_dimension_numbers<[1], [0], [0], [1], [0, 0, 1, 1], [], []>} : vector<32x128xf32>, vector<128x128xf32>, vector<32x128xf32> -> vector<32x128xf32>
    %c0_206 = arith.constant 0 : index
    %c0_207 = arith.constant 0 : index
    %151 = vector.load %arg12[%c0_206, %c0_207] : memref<32x128xf32, #tpu.memory_space<vmem>>, vector<32x128xf32>
    %152 = arith.addf %151, %150 : vector<32x128xf32>
    %c0_208 = arith.constant 0 : index
    %c0_209 = arith.constant 0 : index
    %153 = vector.load %arg12[%c0_208, %c0_209] : memref<32x128xf32, #tpu.memory_space<vmem>>, vector<32x128xf32>
    tpu.vector_store %arg12[%c0_208, %c0_209], %152 {strides = array<i32>} : memref<32x128xf32, #tpu.memory_space<vmem>>, vector<32x128xf32>,
    %c1_210 = arith.constant 1 : index
    %c0_211 = arith.constant 0 : index
    %c1_212 = arith.constant 1 : index
    %c1_213 = arith.constant 1 : index
    %c0_214 = arith.constant 0 : index
    %154 = vector.load %arg13[%c1_210, %c0_211, %c1_212, %c1_213, %c0_214] : memref<2x1x5x16x128xf32, #tpu.memory_space<vmem>>, vector<1x1x4x8x128xf32>
    %155 = vector.shape_cast %154 : vector<1x1x4x8x128xf32> to vector<1x4x8x128xf32>
    %156 = vector.shape_cast %155 : vector<1x4x8x128xf32> to vector<32x128xf32>
    %c7_215 = arith.constant 7 : index
    %c0_216 = arith.constant 0 : index
    %c0_217 = arith.constant 0 : index
    %157 = vector.load %arg7[%c7_215, %c0_216, %c0_217] : memref<9x128x128xf32, #tpu.memory_space<vmem>>, vector<1x128x128xf32>
    %158 = vector.shape_cast %157 : vector<1x128x128xf32> to vector<128x128xf32>
    %cst_218 = arith.constant dense<0.000000e+00> : vector<32x128xf32>
    %159 = tpu.matmul %156, %158, %cst_218 {dimension_numbers = #tpu.dot_dimension_numbers<[1], [0], [0], [1], [0, 0, 1, 1], [], []>} : vector<32x128xf32>, vector<128x128xf32>, vector<32x128xf32> -> vector<32x128xf32>
    %c0_219 = arith.constant 0 : index
    %c0_220 = arith.constant 0 : index
    %160 = vector.load %arg12[%c0_219, %c0_220] : memref<32x128xf32, #tpu.memory_space<vmem>>, vector<32x128xf32>
    %161 = arith.addf %160, %159 : vector<32x128xf32>
    %c0_221 = arith.constant 0 : index
    %c0_222 = arith.constant 0 : index
    %162 = vector.load %arg12[%c0_221, %c0_222] : memref<32x128xf32, #tpu.memory_space<vmem>>, vector<32x128xf32>
    tpu.vector_store %arg12[%c0_221, %c0_222], %161 {strides = array<i32>} : memref<32x128xf32, #tpu.memory_space<vmem>>, vector<32x128xf32>,
    %c1_223 = arith.constant 1 : index
    %c0_224 = arith.constant 0 : index
    %c1_225 = arith.constant 1 : index
    %c2_226 = arith.constant 2 : index
    %c0_227 = arith.constant 0 : index
    %163 = vector.load %arg13[%c1_223, %c0_224, %c1_225, %c2_226, %c0_227] : memref<2x1x5x16x128xf32, #tpu.memory_space<vmem>>, vector<1x1x4x8x128xf32>
    %164 = vector.shape_cast %163 : vector<1x1x4x8x128xf32> to vector<1x4x8x128xf32>
    %165 = vector.shape_cast %164 : vector<1x4x8x128xf32> to vector<32x128xf32>
    %c8_228 = arith.constant 8 : index
    %c0_229 = arith.constant 0 : index
    %c0_230 = arith.constant 0 : index
    %166 = vector.load %arg7[%c8_228, %c0_229, %c0_230] : memref<9x128x128xf32, #tpu.memory_space<vmem>>, vector<1x128x128xf32>
    %167 = vector.shape_cast %166 : vector<1x128x128xf32> to vector<128x128xf32>
    %cst_231 = arith.constant dense<0.000000e+00> : vector<32x128xf32>
    %168 = tpu.matmul %165, %167, %cst_231 {dimension_numbers = #tpu.dot_dimension_numbers<[1], [0], [0], [1], [0, 0, 1, 1], [], []>} : vector<32x128xf32>, vector<128x128xf32>, vector<32x128xf32> -> vector<32x128xf32>
    %c0_232 = arith.constant 0 : index
    %c0_233 = arith.constant 0 : index
    %169 = vector.load %arg12[%c0_232, %c0_233] : memref<32x128xf32, #tpu.memory_space<vmem>>, vector<32x128xf32>
    %170 = arith.addf %169, %168 : vector<32x128xf32>
    %c0_234 = arith.constant 0 : index
    %c0_235 = arith.constant 0 : index
    %171 = vector.load %arg12[%c0_234, %c0_235] : memref<32x128xf32, #tpu.memory_space<vmem>>, vector<32x128xf32>
    tpu.vector_store %arg12[%c0_234, %c0_235], %170 {strides = array<i32>} : memref<32x128xf32, #tpu.memory_space<vmem>>, vector<32x128xf32>,
    %c0_236 = arith.constant 0 : index
    %c0_237 = arith.constant 0 : index
    %172 = vector.load %arg12[%c0_236, %c0_237] : memref<32x128xf32, #tpu.memory_space<vmem>>, vector<32x128xf32>
    %c0_238 = arith.constant 0 : index
    %c0_239 = arith.constant 0 : index
    %173 = vector.load %arg10[%c0_238, %c0_239] : memref<32x128xf32, #tpu.memory_space<vmem>>, vector<32x128xf32>
    tpu.vector_store %arg10[%c0_238, %c0_239], %172 {strides = array<i32>} : memref<32x128xf32, #tpu.memory_space<vmem>>, vector<32x128xf32>,
    return
  }
  func.func @transform_0(%arg0: i32) -> (i32, i32, i32, i32) {
    %c0_i32 = arith.constant 0 : i32
    %c0_i32_0 = arith.constant 0 : i32
    %c0_i32_1 = arith.constant 0 : i32
    %c0_i32_2 = arith.constant 0 : i32
    return %arg0, %c0_i32, %c0_i32_0, %c0_i32_1 : i32, i32, i32, i32
  }
  func.func @transform_1(%arg0: i32) -> (i32, i32, i32, i32) {
    %c0_i32 = arith.constant 0 : i32
    %c0_i32_0 = arith.constant 0 : i32
    %c0_i32_1 = arith.constant 0 : i32
    %c0_i32_2 = arith.constant 0 : i32
    return %arg0, %c0_i32, %c0_i32_0, %c0_i32_1 : i32, i32, i32, i32
  }
  func.func @transform_2(%arg0: i32) -> (i32, i32, i32, i32) {
    %c0_i32 = arith.constant 0 : i32
    %c0_i32_0 = arith.constant 0 : i32
    %c0_i32_1 = arith.constant 0 : i32
    %c0_i32_2 = arith.constant 0 : i32
    return %arg0, %c0_i32, %c0_i32_0, %c0_i32_1 : i32, i32, i32, i32
  }
  func.func @transform_3(%arg0: i32) -> (i32, i32, i32, i32) {
    %c0_i32 = arith.constant 0 : i32
    %c0_i32_0 = arith.constant 0 : i32
    %c0_i32_1 = arith.constant 0 : i32
    %c0_i32_2 = arith.constant 0 : i32
    return %arg0, %c0_i32, %c0_i32_0, %c0_i32_1 : i32, i32, i32, i32
  }
  func.func @transform_4(%arg0: i32) -> (i32, i32, i32) {
    %c0_i32 = arith.constant 0 : i32
    %c0_i32_0 = arith.constant 0 : i32
    %c0_i32_1 = arith.constant 0 : i32
    %c0_i32_2 = arith.constant 0 : i32
    return %c0_i32, %c0_i32_0, %c0_i32_1 : i32, i32, i32
  }
  func.func @transform_5(%arg0: i32) -> (i32, i32) {
    %c0_i32 = arith.constant 0 : i32
    %c0_i32_0 = arith.constant 0 : i32
    %c0_i32_1 = arith.constant 0 : i32
    return %c0_i32, %c0_i32_0 : i32, i32
  }
  func.func @transform_6(%arg0: i32) -> (i32, i32, i32) {
    %c0_i32 = arith.constant 0 : i32
    %c0_i32_0 = arith.constant 0 : i32
    %c0_i32_1 = arith.constant 0 : i32
    %c0_i32_2 = arith.constant 0 : i32
    return %c0_i32, %c0_i32_0, %c0_i32_1 : i32, i32, i32
  }
  func.func @transform_7(%arg0: i32) -> (i32, i32) {
    %c0_i32 = arith.constant 0 : i32
    %c0_i32_0 = arith.constant 0 : i32
    %c0_i32_1 = arith.constant 0 : i32
    return %c0_i32, %c0_i32_0 : i32, i32
  }
  func.func @transform_8(%arg0: i32) -> (i32, i32) {
    %c0_i32 = arith.constant 0 : i32
    %c0_i32_0 = arith.constant 0 : i32
    return %arg0, %c0_i32 : i32, i32
  }
  func.func @transform_9(%arg0: i32) -> (i32, i32) {
    %c0_i32 = arith.constant 0 : i32
    %c0_i32_0 = arith.constant 0 : i32
    return %arg0, %c0_i32 : i32, i32
  }
}

</mosaic_0001>

<bundles_post_ra>
// kernel: tpu_custom_call.1
= control target key start
LH: loop header
LB: loop body
LE: loop exit
PB: predicated region body
PF: predicated region fallthrough
CT: control target
= control target key end

     0   :  { %15 = vsyncpa [#allocation6], 0  ;;  %s5934_s0 = inlined_call_operand.vmem [shape: f32[2,9,9,32], index: 0, kind: input, shape index: {}]   ;;  %s5935_s1 = inlined_call_operand.vmem [shape: f32[2,9,9,32], index: 1, kind: input, shape index: {}]   ;;  %s5936_s2 = inlined_call_operand.vmem [shape: f32[2,9,9,32], index: 2, kind: input, shape index: {}]   ;;  %s5937_s3 = inlined_call_operand.vmem [shape: f32[2,9,9,32], index: 3, kind: input, shape index: {}]   ;;  %s5938_s4 = inlined_call_operand.vmem [shape: f32[9,32,128], index: 4, kind: input, shape index: {}]   ;;  %s5939_s5 = inlined_call_operand.vmem [shape: f32[1,128], index: 5, kind: input, shape index: {}]   ;;  %s5940_s6 = inlined_call_operand.vmem [shape: f32[9,128,128], index: 6, kind: input, shape index: {}]   ;;  %s5941_s7 = inlined_call_operand.vmem [shape: f32[1,128], index: 7, kind: input, shape index: {}]   ;;  %s5942_s8 = inlined_call_operand.hbm [shape: f32[128,128], index: 8, kind: output, shape index: {0}]   ;;  %s5943_s9 = inlined_call_operand.hbm [shape: f32[64,128], index: 9, kind: output, shape index: {1}]  }
   0x1   :  { %17 = vsyncpa [#allocation6 + $0x1], 0 }
   0x2   :  { %18 = vsyncpa [#allocation8], 0 }
   0x3   :  { %20 = vsyncpa [#allocation8 + $0x1], 0  ;;  %s4933_s30 = smov 0   ;;  %s4935_s10 = smov 0  }
   0x4   :  { %s4937_s11 = smov 0   ;;  %s4939_s12 = smov 0  }
   0x5 LB: > { %s4954_s13 = sadd.s32 4294967295, %s4876_s12   ;;  %s3178_s14 = sadd.s32 4294967294, %s4876_s12   ;;  %s4876_s12 = sphi %s4939_s12, %s5951_s12   ;;  %s4872_s11 = sphi %s4937_s11, %s5950_s11   ;;  %s4868_s10 = sphi %s4935_s10, %s5949_s10   ;;  %s4864_s30 = sphi %s4933_s30, %s5948_s30  }
   0x6   : > { %s4958_s15 = sadd.s32 1, %s4876_s12   ;;  %s221_s16 = sadd.s32 1, %s4872_s11 }
   0x7   : > { %s218_s17 = ssub.s32 %s4876_s12, %s4958_s15  ;;  %p231_p0 = scmp.ne.s32.totalorder %s4872_s11, %s4868_s10 }
   0x8   : > { %p219_p1 = scmp.eq.s32.totalorder %s218_s17, 0  ;;  %p232_p2 = scmp.eq.s32.totalorder %s4954_s13, 1 }
   0x9   : > { %p237_p3 = scmp.ne.s32.totalorder %s4868_s10, %s4864_s30  ;;  %p238_p4 = scmp.eq.s32.totalorder %s3178_s14, 1 }
   0xa   : > { %s4969_s18 = scalar_select %p219_p1, %s4872_s11, %s221_s16  }
   0xb   : > { %p4971_p5 = por %p232_p2, %p231_p0  ;;  %p4975_p6 = por %p238_p4, %p237_p3 }
   0xc   : > { %p3181_p7 = scmp.ge.s32.totalorder %s4876_s12, 1  ;;  %p326_p8 = scmp.lt.s32.totalorder %s4876_s12, 3 }
   0xe   : > { %p327_p9 = pnand %p3181_p7, %p326_p8 }
   0xf   : > { %v412_v0 = vld [vmem:[%s5938_s4] sm:$0xff] (!%p327_p9)  ;;  %v413_v1 = vld [vmem:[%s5938_s4 + $0x8] sm:$0xff] (!%p327_p9)  ;;  %v414_v2 = vld [vmem:[%s5938_s4 + $0x10] sm:$0xff] (!%p327_p9)  ;;  %p382_p10 = scmp.lt.s32.totalorder (!%p327_p9), %s4954_s13, 1  ;;  %vm423_vm0 = vcmask (!%p327_p9), 261120   ;;  %s4879_s27 = smov (!%p327_p9), [#allocation5]  }
  0x10   : > { %330 = sbr.rel (%p327_p9) target bundleno = 809 (0x329), region = 52  ;;  %v4266_v3 = vpack.c.bf16 (!%p327_p9), %v413_v1, %v412_v0  ;;  %v415_v4 = vld [vmem:[%s5938_s4 + $0x18] sm:$0xff] (!%p327_p9)  ;;  %v3197_v6 = vld [vmem:[%s5938_s4 + $0x20] sm:$0xff] (!%p327_p9)  ;;  %v3198_v7 = vld [vmem:[%s5938_s4 + $0x28] sm:$0xff] (!%p327_p9) }
  0x11   : > { %v4270_v5 = vpack.c.bf16 (!%p327_p9), %v415_v4, %v414_v2  ;;  %v4274_v8 = vpack.c.bf16 (!%p327_p9), %v3198_v7, %v3197_v6  ;;  %v3199_v9 = vld [vmem:[%s5938_s4 + $0x30] sm:$0xff] (!%p327_p9)  ;;  %v3200_v10 = vld [vmem:[%s5938_s4 + $0x38] sm:$0xff] (!%p327_p9)  ;;  %v3209_v15 = vld [vmem:[%s5938_s4 + $0x40] sm:$0xff] (!%p327_p9) }
  0x12   : > { %4267 = vmatprep.subr.bf16.mxu0 (!%p327_p9), %v4266_v3  ;;  %v4278_v14 = vpack.c.bf16 (!%p327_p9), %v3200_v10, %v3199_v9  ;;  %v3210_v16 = vld [vmem:[%s5938_s4 + $0x48] sm:$0xff] (!%p327_p9)  ;;  %v3211_v24 = vld [vmem:[%s5938_s4 + $0x50] sm:$0xff] (!%p327_p9)  ;;  %v3212_v25 = vld [vmem:[%s5938_s4 + $0x58] sm:$0xff] (!%p327_p9) }
  0x13   : > { %4269 = vmatpush3.bf16.msra.mxu0 (!%p327_p9), %v4266_v3  ;;  %v4282_v19 = vpack.c.bf16 (!%p327_p9), %v3210_v16, %v3209_v15  ;;  %v4286_v28 = vpack.c.bf16 (!%p327_p9), %v3212_v25, %v3211_v24  ;;  %v3221_v29 = vld [vmem:[%s5938_s4 + $0x60] sm:$0xff] (!%p327_p9)  ;;  %v3222_v30 = vld [vmem:[%s5938_s4 + $0x68] sm:$0xff] (!%p327_p9)  ;;  %v3336_v37 = vld [vmem:[%s5940_s6 + $0x110] sm:$0xff] (!%p327_p9) }
  0x14   : > { %4271 = vmatprep.subr.bf16.mxu0 (!%p327_p9), %v4270_v5  ;;  %v4290_v33 = vpack.c.bf16 (!%p327_p9), %v3222_v30, %v3221_v29  ;;  %v3334_v34 = vld [vmem:[%s5940_s6 + $0x100] sm:$0xff] (!%p327_p9)  ;;  %v3335_v35 = vld [vmem:[%s5940_s6 + $0x108] sm:$0xff] (!%p327_p9)  ;;  %v3337_v38 = vld [vmem:[%s5940_s6 + $0x118] sm:$0xff] (!%p327_p9) }
  0x15   : > { %v4402_v36 = vpack.c.bf16 (!%p327_p9), %v3335_v35, %v3334_v34  ;;  %v4406_v40 = vpack.c.bf16 (!%p327_p9), %v3337_v38, %v3336_v37  ;;  %v3338_v41 = vld [vmem:[%s5940_s6 + $0x120] sm:$0xff] (!%p327_p9)  ;;  %v3339_v42 = vld [vmem:[%s5940_s6 + $0x128] sm:$0xff] (!%p327_p9)  ;;  %v3340_v46 = vld [vmem:[%s5940_s6 + $0x130] sm:$0xff] (!%p327_p9) }
  0x16   : > { %v4410_v44 = vpack.c.bf16 (!%p327_p9), %v3339_v42, %v3338_v41  ;;  %v3341_v47 = vld [vmem:[%s5940_s6 + $0x138] sm:$0xff] (!%p327_p9)  ;;  %v3223_v49 = vld [vmem:[%s5938_s4 + $0x70] sm:$0xff] (!%p327_p9)  ;;  %v3342_v53 = vld [vmem:[%s5940_s6 + $0x140] sm:$0xff] (!%p327_p9) }
  0x17   : > { %s383_s29 = scalar_select %p382_p10, %s4954_s13, 1  ;;  %4273 = vmatpush3.bf16.msra.mxu0 %v4270_v5  ;;  %4403 = vmatprep.subr.bf16.mxu1 %v4402_v36  ;;  %v3224_v50 = vld [vmem:[%s5938_s4 + $0x78] sm:$0xff]  ;;  %v4414_v51 = vpack.c.bf16 %v3341_v47, %v3340_v46  ;;  %v3343_v54 = vld [vmem:[%s5940_s6 + $0x148] sm:$0xff]  ;;  %v3233_v57 = vld [vmem:[%s5938_s4 + $0x80] sm:$0xff] }
  0x18   : > { %4275 = vmatprep.subr.bf16.mxu0 %v4274_v8  ;;  %4405 = vmatpush3.bf16.msra.mxu1 %v4402_v36  ;;  %v4294_v56 = vpack.c.bf16 %v3224_v50, %v3223_v49  ;;  %v3234_v58 = vld [vmem:[%s5938_s4 + $0x88] sm:$0xff]  ;;  %v4418_v59 = vpack.c.bf16 %v3343_v54, %v3342_v53  ;;  %v3235_v3 = vld [vmem:[%s5938_s4 + $0x90] sm:$0xff]  ;;  %v3236_v4 = vld [vmem:[%s5938_s4 + $0x98] sm:$0xff] }
  0x19   : > { %s5001_s22 = smul.u32 144, %s383_s29  ;;  %4407 = vmatprep.subr.bf16.mxu1 %v4406_v40  ;;  %v4298_v62 = vpack.c.bf16 %v3234_v58, %v3233_v57  ;;  %v4302_v7 = vpack.c.bf16 %v3236_v4, %v3235_v3  ;;  %v3246_v9 = vld [vmem:[%s5938_s4 + $0xa8] sm:$0xff]  ;;  %v3247_v24 = vld [vmem:[%s5938_s4 + $0xb0] sm:$0xff]  ;;  %v3248_v25 = vld [vmem:[%s5938_s4 + $0xb8] sm:$0xff] }
  0x1a   : > { %v4310_v30 = vpack.c.bf16 %v3248_v25, %v3247_v24  ;;  %v3266_v34 = vld [vmem:[%s5938_s4 + $0xc8] sm:$0xff]  ;;  %v3268_v46 = vld [vmem:[%s5938_s4 + $0xd8] sm:$0xff]  ;;  %v3285_v50 = vld [vmem:[%s5938_s4 + $0xe0] sm:$0xff] }
  0x1b   : > { %s5007_s25 = scalar_lea.vmem %s5934_s0, %s5001_s22  ;;  %s5053_s26 = scalar_lea.vmem %s5935_s1, %s5001_s22  ;;  %v3305_v4 = vld [vmem:[%s5938_s4 + $0x100] sm:$0xff]  ;;  %v3347_v24 = vld [vmem:[%s5940_s6 + $0x168] sm:$0xff] }
  0x1c   : > { %v404_v11 = vld [vmem:[%s5007_s25] sm:$0xff]  ;;  %v5018_v12 = vld [vmem:[%s5007_s25 + $0x10] sm:$0xff]  ;;  %4409 = vmatpush3.bf16.msra.mxu1 %v4406_v40  ;;  %s5187_s29 = scalar_lea.vmem %s5936_s2, %s5001_s22  ;;  %s401_s17 = scalar_lea.vmem %s5937_s3, %s5001_s22 }
  0x1d   : > { %3752 = vmatprep.mubr.msk.f32.mxu0 %vm423_vm0, %v404_v11  ;;  %v5021_v13 = vld [vmem:[%s5007_s25 + $0x20] sm:$0xff]  ;;  %v5034_v17 = vld [vmem:[%s5007_s25 + $0x30] sm:$0xff]  ;;  %4411 = vmatprep.subr.bf16.mxu1 %v4410_v44  ;;  %s4786_s22 = sshll.u32 %s4879_s27, 4  ;;  %s4787_s22 = int_to_ptr.vmem [resolvable:$false] %s4786_s22 }
  0x1e   : > { %3753 = vmatmul.mubr.msk.f32.vlgmr.msra.gmra.mrb[0].mxu0 %vm423_vm0, %v5018_v12  ;;  %v5037_v18 = vld [vmem:[%s5007_s25 + $0x40] sm:$0xff]  ;;  %v5044_v20 = vld [vmem:[%s5007_s25 + $0x50] sm:$0xff] }
  0x1f   : > { %4277 = vmatpush3.bf16.msra.mxu0 %v4274_v8  ;;  %3755 = vmatprep.mubr.msk.f32.mxu0 %vm423_vm0, %v5021_v13  ;;  %v5047_v21 = vld [vmem:[%s5007_s25 + $0x60] sm:$0xff]  ;;  %v5060_v22 = vld [vmem:[%s5007_s25 + $0x70] sm:$0xff] }
  0x20   : > { %4279 = vmatprep.subr.bf16.mxu0 %v4278_v14  ;;  %v561_v23 = vld [vmem:[%s5053_s26] sm:$0xff]  ;;  %v5073_v26 = vld [vmem:[%s5053_s26 + $0x10] sm:$0xff]  ;;  %4413 = vmatpush3.bf16.msra.mxu1 %v4410_v44 }
  0x21   : > { %v5076_v27 = vld [vmem:[%s5053_s26 + $0x20] sm:$0xff]  ;;  %v5089_v31 = vld [vmem:[%s5053_s26 + $0x30] sm:$0xff]  ;;  %4415 = vmatprep.subr.bf16.mxu1 %v4414_v51 }
  0x22   : > { %3756 = vmatmul.mubr.msk.f32.gmra.mrb[2].mxu0 %vm423_vm0, %v5034_v17  ;;  %v5092_v32 = vld [vmem:[%s5053_s26 + $0x40] sm:$0xff]  ;;  %v5111_v39 = vld [vmem:[%s5053_s26 + $0x50] sm:$0xff] }
  0x23   : > { %3758 = vmatprep.mubr.msk.f32.mxu0 %vm423_vm0, %v5037_v18  ;;  %4281 = vmatpush3.bf16.msra.mxu0 %v4278_v14  ;;  %v5120_v43 = vld [vmem:[%s5053_s26 + $0x60] sm:$0xff]  ;;  %v5127_v45 = vld [vmem:[%s5053_s26 + $0x70] sm:$0xff] }
  0x24   : > { %4283 = vmatprep.subr.bf16.mxu0 %v4282_v19  ;;  %v727_v48 = vld [vmem:[%s5007_s25 + $0x1] sm:$0xff]  ;;  %v5146_v52 = vld [vmem:[%s5007_s25 + $0x11] sm:$0xff]  ;;  %4417 = vmatpush3.bf16.msra.mxu1 %v4414_v51 }
  0x25   : > { %v5155_v55 = vld [vmem:[%s5007_s25 + $0x21] sm:$0xff]  ;;  %v5168_v60 = vld [vmem:[%s5007_s25 + $0x31] sm:$0xff]  ;;  %4419 = vmatprep.subr.bf16.mxu1 %v4418_v59 }
  0x26   : > { %3759 = vmatmul.mubr.msk.f32.gmra.mrb[4].mxu0 %vm423_vm0, %v5044_v20  ;;  %v5171_v61 = vld [vmem:[%s5007_s25 + $0x41] sm:$0xff]  ;;  %v5178_v63 = vld [vmem:[%s5007_s25 + $0x51] sm:$0xff] }
  0x27   : > { %3761 = vmatprep.mubr.msk.f32.mxu0 %vm423_vm0, %v5047_v21  ;;  %v5181_v0 = vld [vmem:[%s5007_s25 + $0x61] sm:$0xff]  ;;  %v5194_v1 = vld [vmem:[%s5007_s25 + $0x71] sm:$0xff] }
  0x28   : > { %4421 = vmatpush3.bf16.msra.mxu1 %v4418_v59  ;;  %v893_v2 = vld [vmem:[%s5187_s29] sm:$0xff]  ;;  %v894_v5 = vld [vmem:[%s5187_s29 + $0x10] sm:$0xff]  ;;  %v3286_v51 = vld [vmem:[%s5938_s4 + $0xe8] sm:$0xff] }
  0x29   : > { %v895_v6 = vld [vmem:[%s5187_s29 + $0x20] sm:$0xff]  ;;  %v896_v10 = vld [vmem:[%s5187_s29 + $0x30] sm:$0xff] }
  0x2a   : > { %3762 = vmatmul.mubr.msk.f32.gmra.mrb[6].mxu0 %vm423_vm0, %v5060_v22  ;;  %v3245_v8 = vld [vmem:[%s5938_s4 + $0xa0] sm:$0xff]  ;;  %v898_v15 = vld [vmem:[%s5187_s29 + $0x50] sm:$0xff] }
  0x2b   : > { %3772 = vmatprep.mubr.msk.f32.mxu0 %vm423_vm0, %v561_v23  ;;  %v897_v11 = vld [vmem:[%s5187_s29 + $0x40] sm:$0xff]  ;;  %v4306_v14 = vpack.c.bf16 %v3246_v9, %v3245_v8  ;;  %v1062_v35 = vld [vmem:[%s401_s17 + $0x30] sm:$0xff]  ;;  %v1958_v8 = vld [vmem:[%s5940_s6 + $0x48] sm:$0xff] }
  0x2c   : > { %v899_v16 = vld [vmem:[%s5187_s29 + $0x60] sm:$0xff]  ;;  %v1064_v38 = vld [vmem:[%s401_s17 + $0x50] sm:$0xff] }
  0x2d   : > { %v1059_v23 = vld [vmem:[%s401_s17] sm:$0xff]  ;;  %v1066_v41 = vld [vmem:[%s401_s17 + $0x70] sm:$0xff] }
  0x2e   : > { %3773 = vmatmul.mubr.msk.f32.vlgmr.msra.gmra.mrb[0].mxu0 %vm423_vm0, %v5073_v26  ;;  %v1061_v29 = vld [vmem:[%s401_s17 + $0x20] sm:$0xff]  ;;  %v3267_v44 = vld [vmem:[%s5938_s4 + $0xd0] sm:$0xff] }
  0x2f   : > { %4285 = vmatpush3.bf16.msra.mxu0 %v4282_v19  ;;  %3775 = vmatprep.mubr.msk.f32.mxu0 %vm423_vm0, %v5076_v27  ;;  %v900_v19 = vld [vmem:[%s5187_s29 + $0x70] sm:$0xff]  ;;  %v1063_v36 = vld [vmem:[%s401_s17 + $0x40] sm:$0xff]  ;;  %v4318_v49 = vpack.c.bf16 %v3268_v46, %v3267_v44 }
  0x30   : > { %4287 = vmatprep.subr.bf16.mxu0 %v4286_v28  ;;  %v1065_v40 = vld [vmem:[%s401_s17 + $0x60] sm:$0xff]  ;;  %v1226_v47 = vld [vmem:[%s5187_s29 + $0x11] sm:$0xff] }
  0x31   : > { %v1225_v42 = vld [vmem:[%s5187_s29 + $0x1] sm:$0xff]  ;;  %v1228_v53 = vld [vmem:[%s5187_s29 + $0x31] sm:$0xff] }
  0x32   : > { %3776 = vmatmul.mubr.msk.f32.gmra.mrb[2].mxu0 %vm423_vm0, %v5089_v31  ;;  %v1229_v54 = vld [vmem:[%s5187_s29 + $0x41] sm:$0xff]  ;;  %v1230_v57 = vld [vmem:[%s5187_s29 + $0x51] sm:$0xff] }
  0x33   : > { %3778 = vmatprep.mubr.msk.f32.mxu0 %vm423_vm0, %v5092_v32  ;;  %4289 = vmatpush3.bf16.msra.mxu0 %v4286_v28  ;;  %v1060_v28 = vld [vmem:[%s401_s17 + $0x10] sm:$0xff]  ;;  %v1231_v58 = vld [vmem:[%s5187_s29 + $0x61] sm:$0xff]  ;;  %s5423_s17 = sand.u32 1, %s4868_s10  }
  0x34   : > { %4291 = vmatprep.subr.bf16.mxu0 %v4290_v33  ;;  %v1232_v59 = vld [vmem:[%s5187_s29 + $0x71] sm:$0xff]  ;;  %s3182_s28 = sshll.u32 %s5423_s17, 6 }
  0x35   : > { %v1959_v9 = vld [vmem:[%s5940_s6 + $0x50] sm:$0xff]  ;;  %s5431_s21 = scalar_lea.vmem [#allocation5], %s3182_s28 }
  0x36   : > { %3779 = vmatmul.mubr.msk.f32.gmra.mrb[4].mxu0 %vm423_vm0, %v5111_v39  ;;  %s3032_s28 = sshll.u32 %s5431_s21, 4  ;;  %s5849_s28 = int_to_ptr.vmem [resolvable:$true] %s3032_s28 }
  0x37   : > { %3781 = vmatprep.mubr.msk.f32.mxu0 %vm423_vm0, %v5120_v43  ;;  %s4782_s24 = scalar_lea.vmem %s5849_s28, 1024  ;;  %p4789_p0 = scmp.lt.s32.totalorder %s5849_s28, %s4787_s22 }
  0x38   : > { %p4783_p11 = scmp.ne.s32.totalorder %s5849_s28, %s4782_s24 }
  0x3a   : > { %3782 = vmatmul.mubr.msk.f32.gmra.mrb[6].mxu0 %vm423_vm0, %v5127_v45  ;;  %p4784_p12 = pnand %p4783_p11, %p4971_p5 }
  0x3b   : > { %3792 = vmatprep.mubr.msk.f32.mxu0 %vm423_vm0, %v727_v48  ;;  %v1227_v48 = vld [vmem:[%s5187_s29 + $0x21] sm:$0xff]  ;;  %s3454_s29 = sshll.u32 %s4954_s13, 10 }
  0x3c   : > { %s5847_s23 = scalar_lea.hbm %s5942_s8, %s3454_s29  ;;  %p4785_p13 = pneg %p4784_p12 }
  0x3e   : > { %3793 = vmatmul.mubr.msk.f32.vlgmr.msra.gmra.mrb[0].mxu0 %vm423_vm0, %v5146_v52 }
  0x3f   : > { %4293 = vmatpush3.bf16.msra.mxu0 %v4290_v33  ;;  %3795 = vmatprep.mubr.msk.f32.mxu0 %vm423_vm0, %v5155_v55  ;;  %v3265_v33 = vld [vmem:[%s5938_s4 + $0xc0] sm:$0xff] }
  0x40   : > { %4295 = vmatprep.subr.bf16.mxu0 %v4294_v56  ;;  %v4314_v37 = vpack.c.bf16 %v3266_v34, %v3265_v33  ;;  %v3348_v33 = vld [vmem:[%s5940_s6 + $0x170] sm:$0xff] }
  0x42   : > { %3796 = vmatmul.mubr.msk.f32.gmra.mrb[2].mxu0 %vm423_vm0, %v5168_v60 }
  0x43   : > { %3798 = vmatprep.mubr.msk.f32.mxu0 %vm423_vm0, %v5171_v61  ;;  %4297 = vmatpush3.bf16.msra.mxu0 %v4294_v56  ;;  %v4322_v56 = vpack.c.bf16 %v3286_v51, %v3285_v50 }
  0x44   : > { %4299 = vmatprep.subr.bf16.mxu0 %v4298_v62 }
  0x46   : > { %3799 = vmatmul.mubr.msk.f32.gmra.mrb[4].mxu0 %vm423_vm0, %v5178_v63 }
  0x47   : > { %3801 = vmatprep.mubr.msk.f32.mxu0 %vm423_vm0, %v5181_v0 }
  0x4a   : > { %3802 = vmatmul.mubr.msk.f32.gmra.mrb[6].mxu0 %vm423_vm0, %v5194_v1 }
  0x4b   : > { %3812 = vmatprep.mubr.msk.f32.mxu0 %vm423_vm0, %v893_v2  ;;  %v3288_v2 = vld [vmem:[%s5938_s4 + $0xf8] sm:$0xff] }
  0x4e   : > { %3813 = vmatmul.mubr.msk.f32.vlgmr.msra.gmra.mrb[0].mxu0 %vm423_vm0, %v894_v5  ;;  %v3306_v5 = vld [vmem:[%s5938_s4 + $0x108] sm:$0xff] }
  0x4f   : > { %4301 = vmatpush3.bf16.msra.mxu0 %v4298_v62  ;;  %3815 = vmatprep.mubr.msk.f32.mxu0 %vm423_vm0, %v895_v6  ;;  %v3287_v62 = vld [vmem:[%s5938_s4 + $0xf0] sm:$0xff]  ;;  %v4330_v6 = vpack.c.bf16 %v3306_v5, %v3305_v4  ;;  %v3321_v5 = vld [vmem:[%s5940_s6 + $0x98] sm:$0xff] }
  0x50   : > { %4303 = vmatprep.subr.bf16.mxu0 %v4302_v7  ;;  %v4326_v3 = vpack.c.bf16 %v3288_v2, %v3287_v62  ;;  %v3320_v2 = vld [vmem:[%s5940_s6 + $0x90] sm:$0xff] }
  0x52   : > { %3816 = vmatmul.mubr.msk.f32.gmra.mrb[2].mxu0 %vm423_vm0, %v896_v10 }
  0x53   : > { %3818 = vmatprep.mubr.msk.f32.mxu0 %vm423_vm0, %v897_v11  ;;  %4305 = vmatpush3.bf16.msra.mxu0 %v4302_v7  ;;  %v1956_v7 = vld [vmem:[%s5940_s6 + $0x38] sm:$0xff] }
  0x54   : > { %4307 = vmatprep.subr.bf16.mxu0 %v4306_v14  ;;  %v3345_v11 = vld [vmem:[%s5940_s6 + $0x158] sm:$0xff] }
  0x56   : > { %3819 = vmatmul.mubr.msk.f32.gmra.mrb[4].mxu0 %vm423_vm0, %v898_v15  ;;  %v1961_v15 = vld [vmem:[%s5940_s6 + $0x60] sm:$0xff] }
  0x57   : > { %3821 = vmatprep.mubr.msk.f32.mxu0 %vm423_vm0, %v899_v16  ;;  %v1962_v16 = vld [vmem:[%s5940_s6 + $0x68] sm:$0xff] }
  0x5a   : > { %3822 = vmatmul.mubr.msk.f32.gmra.mrb[6].mxu0 %vm423_vm0, %v900_v19  ;;  %v3346_v19 = vld [vmem:[%s5940_s6 + $0x160] sm:$0xff] }
  0x5b   : > { %3832 = vmatprep.mubr.msk.f32.mxu0 %vm423_vm0, %v1059_v23  ;;  %v4362_v23 = vpack.c.bf16 %v1962_v16, %v1961_v15  ;;  %v4426_v25 = vpack.c.bf16 %v3347_v24, %v3346_v19  ;;  %v3357_v15 = vld [vmem:[%s5940_s6 + $0x1b8] sm:$0xff]  ;;  %v3326_v19 = vld [vmem:[%s5940_s6 + $0xc0] sm:$0xff] }
  0x5c   : > { %v3358_v24 = vld [vmem:[%s5940_s6 + $0x1c0] sm:$0xff] }
  0x5e   : > { %3833 = vmatmul.mubr.msk.f32.vlgmr.msra.gmra.mrb[0].mxu0 %vm423_vm0, %v1060_v28  ;;  %v4878_v28 = vmov 0.0  }
  0x5f   : > { %4309 = vmatpush3.bf16.msra.mxu0 %v4306_v14  ;;  %3835 = vmatprep.mubr.msk.f32.mxu0 %vm423_vm0, %v1061_v29  ;;  %1927 = vst [vmem:[#allocation4 + $0x60] sm:$0xff] %v4878_v28  ;;  %1928 = vst [vmem:[#allocation4 + $0x68] sm:$0xff] %v4878_v28  ;;  %v1963_v29 = vld [vmem:[%s5940_s6 + $0x70] sm:$0xff] }
  0x60   : > { %4311 = vmatprep.subr.bf16.mxu0 %v4310_v30  ;;  %1915 = vst [vmem:[#allocation4] sm:$0xff] %v4878_v28  ;;  %1916 = vst [vmem:[#allocation4 + $0x8] sm:$0xff] %v4878_v28 }
  0x61   : > { %1917 = vst [vmem:[#allocation4 + $0x10] sm:$0xff] %v4878_v28  ;;  %1918 = vst [vmem:[#allocation4 + $0x18] sm:$0xff] %v4878_v28 }
  0x62   : > { %3836 = vmatmul.mubr.msk.f32.gmra.mrb[2].mxu0 %vm423_vm0, %v1062_v35  ;;  %1919 = vst [vmem:[#allocation4 + $0x20] sm:$0xff] %v4878_v28  ;;  %1920 = vst [vmem:[#allocation4 + $0x28] sm:$0xff] %v4878_v28  ;;  %v3349_v35 = vld [vmem:[%s5940_s6 + $0x178] sm:$0xff] }
  0x63   : > { %3838 = vmatprep.mubr.msk.f32.mxu0 %vm423_vm0, %v1063_v36  ;;  %4313 = vmatpush3.bf16.msra.mxu0 %v4310_v30  ;;  %1921 = vst [vmem:[#allocation4 + $0x30] sm:$0xff] %v4878_v28  ;;  %1922 = vst [vmem:[#allocation4 + $0x38] sm:$0xff] %v4878_v28  ;;  %v1964_v30 = vld [vmem:[%s5940_s6 + $0x78] sm:$0xff]  ;;  %v4430_v36 = vpack.c.bf16 %v3349_v35, %v3348_v33 }
  0x64   : > { %4315 = vmatprep.subr.bf16.mxu0 %v4314_v37  ;;  %1925 = vst [vmem:[#allocation4 + $0x50] sm:$0xff] %v4878_v28  ;;  %1926 = vst [vmem:[#allocation4 + $0x58] sm:$0xff] %v4878_v28  ;;  %v4366_v34 = vpack.c.bf16 %v1964_v30, %v1963_v29  ;;  %v3359_v30 = vld [vmem:[%s5940_s6 + $0x1c8] sm:$0xff] }
  0x65   : > { %1929 = vst [vmem:[#allocation4 + $0x70] sm:$0xff] %v4878_v28  ;;  %1930 = vst [vmem:[#allocation4 + $0x78] sm:$0xff] %v4878_v28 }
  0x66   : > { %3839 = vmatmul.mubr.msk.f32.gmra.mrb[4].mxu0 %vm423_vm0, %v1064_v38  ;;  %1931 = vst [vmem:[#allocation4 + $0x80] sm:$0xff] %v4878_v28  ;;  %1932 = vst [vmem:[#allocation4 + $0x88] sm:$0xff] %v4878_v28  ;;  %v3319_v38 = vld [vmem:[%s5940_s6 + $0x88] sm:$0xff] }
  0x67   : > { %3841 = vmatprep.mubr.msk.f32.mxu0 %vm423_vm0, %v1065_v40  ;;  %1933 = vst [vmem:[#allocation4 + $0x90] sm:$0xff] %v4878_v28  ;;  %1934 = vst [vmem:[#allocation4 + $0x98] sm:$0xff] %v4878_v28  ;;  %v3350_v40 = vld [vmem:[%s5940_s6 + $0x180] sm:$0xff] }
  0x6a   : > { %3842 = vmatmul.mubr.msk.f32.gmra.mrb[6].mxu0 %vm423_vm0, %v1066_v41 }
  0x6b   : > { %3852 = vmatprep.mubr.msk.f32.mxu0 %vm423_vm0, %v1225_v42  ;;  %v3351_v42 = vld [vmem:[%s5940_s6 + $0x188] sm:$0xff]  ;;  %v2179_v44 = vld [vmem:[#allocation4 + $0x52] sm:$0xff] }
  0x6c   : > { %v4434_v46 = vpack.c.bf16 %v3351_v42, %v3350_v40  ;;  %4032 = vmatprep.mubr.f32.mxu1 %v2179_v44  ;;  %v2061_v33 = vld [vmem:[#allocation4 + $0x51] sm:$0xff] }
  0x6d   : > { %v3360_v40 = vld [vmem:[%s5940_s6 + $0x1d0] sm:$0xff] }
  0x6e   : > { %3853 = vmatmul.mubr.msk.f32.vlgmr.msra.gmra.mrb[0].mxu0 %vm423_vm0, %v1226_v47  ;;  %v3188_v47 = vld [vmem:[%s5939_s5] ss:$0 sm:$0xff] }
  0x6f   : > { %4317 = vmatpush3.bf16.msra.mxu0 %v4314_v37  ;;  %3855 = vmatprep.mubr.msk.f32.mxu0 %vm423_vm0, %v1227_v48  ;;  %v3318_v37 = vld [vmem:[%s5940_s6 + $0x80] sm:$0xff] }
  0x70   : > { %4319 = vmatprep.subr.bf16.mxu0 %v4318_v49  ;;  %v4370_v41 = vpack.c.bf16 %v3319_v38, %v3318_v37  ;;  %v3328_v37 = vld [vmem:[%s5940_s6 + $0xd0] sm:$0xff]  ;;  %v3329_v38 = vld [vmem:[%s5940_s6 + $0xd8] sm:$0xff] }
  0x71   : > { %v4390_v42 = vpack.c.bf16 %v3329_v38, %v3328_v37  ;;  %v3384_v38 = vld [vmem:[%s5940_s6 + $0x290] sm:$0xff] }
  0x72   : > { %3856 = vmatmul.mubr.msk.f32.gmra.mrb[2].mxu0 %vm423_vm0, %v1228_v53 }
  0x73   : > { %3858 = vmatprep.mubr.msk.f32.mxu0 %vm423_vm0, %v1229_v54  ;;  %4321 = vmatpush3.bf16.msra.mxu0 %v4318_v49 }
  0x74   : > { %4323 = vmatprep.subr.bf16.mxu0 %v4322_v56 }
  0x76   : > { %3859 = vmatmul.mubr.msk.f32.gmra.mrb[4].mxu0 %vm423_vm0, %v1230_v57 }
  0x77   : > { %3861 = vmatprep.mubr.msk.f32.mxu0 %vm423_vm0, %v1231_v58 }
  0x7a   : > { %3862 = vmatmul.mubr.msk.f32.gmra.mrb[6].mxu0 %vm423_vm0, %v1232_v59 }
  0x7b   : > { %3872 = vmatprep.mubr.msk.f32.mxu0 %vm423_vm0, %v5018_v12  ;;  %v3264_v12 = vld [vmem:[%s5007_s25 + $0x80] sm:$0xff] }
  0x7e   : > { %3873 = vmatmul.mubr.msk.f32.vlgmr.msra.gmra.mrb[0].mxu0 %vm423_vm0, %v5021_v13  ;;  %v3307_v13 = vld [vmem:[%s5938_s4 + $0x110] sm:$0xff] }
  0x7f   : > { %4325 = vmatpush3.bf16.msra.mxu0 %v4322_v56  ;;  %3875 = vmatprep.mubr.msk.f32.mxu0 %vm423_vm0, %v5034_v17  ;;  %v3308_v17 = vld [vmem:[%s5938_s4 + $0x118] sm:$0xff] }
  0x80   : > { %4327 = vmatprep.subr.bf16.mxu0 %v4326_v3 }
  0x82   : > { %3876 = vmatmul.mubr.msk.f32.gmra.mrb[2].mxu0 %vm423_vm0, %v5037_v18  ;;  %v4334_v18 = vpack.c.bf16 %v3308_v17, %v3307_v13 }
  0x83   : > { %3878 = vmatprep.mubr.msk.f32.mxu0 %vm423_vm0, %v5044_v20  ;;  %4329 = vmatpush3.bf16.msra.mxu0 %v4326_v3  ;;  %v1949_v20 = vld [vmem:[%s5940_s6] sm:$0xff] }
  0x84   : > { %4331 = vmatprep.subr.bf16.mxu0 %v4330_v6 }
  0x86   : > { %3879 = vmatmul.mubr.msk.f32.gmra.mrb[4].mxu0 %vm423_vm0, %v5047_v21  ;;  %v1950_v21 = vld [vmem:[%s5940_s6 + $0x8] sm:$0xff] }
  0x87   : > { %3881 = vmatprep.mubr.msk.f32.mxu0 %vm423_vm0, %v5060_v22  ;;  %v4338_v22 = vpack.c.bf16 %v1950_v21, %v1949_v20  ;;  %v4374_v21 = vpack.c.bf16 %v3321_v5, %v3320_v2  ;;  %v3364_v2 = vld [vmem:[%s5940_s6 + $0x1f0] sm:$0xff] }
  0x8a   : > { %3882 = vmatmul.mubr.msk.f32.gmra.mrb[6].mxu0 %vm423_vm0, %v3264_v12  ;;  %v3353_v12 = vld [vmem:[%s5940_s6 + $0x198] sm:$0xff] }
  0x8b   : > { %3892 = vmatprep.mubr.msk.f32.mxu0 %vm423_vm0, %v5073_v26  ;;  %v3284_v26 = vld [vmem:[%s5053_s26 + $0x80] sm:$0xff]  ;;  %s3014_s26 = scalar_lea.sflag [#allocation6], %s5423_s17 }
  0x8e   : > { %3893 = vmatmul.mubr.msk.f32.vlgmr.msra.gmra.mrb[0].mxu0 %vm423_vm0, %v5076_v27  ;;  %v1951_v27 = vld [vmem:[%s5940_s6 + $0x10] sm:$0xff] }
  0x8f   : > { %4333 = vmatpush3.bf16.msra.mxu0 %v4330_v6  ;;  %3895 = vmatprep.mubr.msk.f32.mxu0 %vm423_vm0, %v5089_v31  ;;  %v1952_v31 = vld [vmem:[%s5940_s6 + $0x18] sm:$0xff]  ;;  %v3352_v6 = vld [vmem:[%s5940_s6 + $0x190] sm:$0xff] }
  0x90   : > { %4335 = vmatprep.subr.bf16.mxu0 %v4334_v18 }
  0x92   : > { %3896 = vmatmul.mubr.msk.f32.gmra.mrb[2].mxu0 %vm423_vm0, %v5092_v32  ;;  %v4342_v32 = vpack.c.bf16 %v1952_v31, %v1951_v27  ;;  %v3323_v27 = vld [vmem:[%s5940_s6 + $0xa8] sm:$0xff]  ;;  %v3354_v31 = vld [vmem:[%s5940_s6 + $0x1a0] sm:$0xff] }
  0x93   : > { %3898 = vmatprep.mubr.msk.f32.mxu0 %vm423_vm0, %v5111_v39  ;;  %4337 = vmatpush3.bf16.msra.mxu0 %v4334_v18  ;;  %v1953_v39 = vld [vmem:[%s5940_s6 + $0x20] sm:$0xff] }
  0x94   : > { %4339 = vmatprep.subr.bf16.mxu0 %v4338_v22 }
  0x96   : > { %3899 = vmatmul.mubr.msk.f32.gmra.mrb[4].mxu0 %vm423_vm0, %v5120_v43  ;;  %v1954_v43 = vld [vmem:[%s5940_s6 + $0x28] sm:$0xff] }
  0x97   : > { %3901 = vmatprep.mubr.msk.f32.mxu0 %vm423_vm0, %v5127_v45  ;;  %v4346_v45 = vpack.c.bf16 %v1954_v43, %v1953_v39 }
  0x9a   : > { %3902 = vmatmul.mubr.msk.f32.gmra.mrb[6].mxu0 %vm423_vm0, %v3284_v26  ;;  %v3322_v26 = vld [vmem:[%s5940_s6 + $0xa0] sm:$0xff] }
  0x9b   : > { %3912 = vmatprep.mubr.msk.f32.mxu0 %vm423_vm0, %v5146_v52  ;;  %v1955_v52 = vld [vmem:[%s5940_s6 + $0x30] sm:$0xff] }
  0x9e   : > { %3913 = vmatmul.mubr.msk.f32.vlgmr.msra.gmra.mrb[0].mxu0 %vm423_vm0, %v5155_v55  ;;  %v4350_v55 = vpack.c.bf16 %v1956_v7, %v1955_v52  ;;  %v3355_v52 = vld [vmem:[%s5940_s6 + $0x1a8] sm:$0xff] }
  0x9f   : > { %3915 = vmatprep.mubr.msk.f32.mxu0 %vm423_vm0, %v5168_v60  ;;  %4341 = vmatpush3.bf16.msra.mxu0 %v4338_v22  ;;  %v1957_v60 = vld [vmem:[%s5940_s6 + $0x40] sm:$0xff]  ;;  %v4438_v22 = vpack.c.bf16 %v3353_v12, %v3352_v6 }
  0xa0   : > { %4343 = vmatprep.subr.bf16.mxu0 %v4342_v32  ;;  %v3366_v12 = vld [vmem:[%s5940_s6 + $0x200] sm:$0xff] }
  0xa2   : > { %3916 = vmatmul.mubr.msk.f32.gmra.mrb[2].mxu0 %vm423_vm0, %v5171_v61  ;;  %v3304_v61 = vld [vmem:[%s5007_s25 + $0x81] sm:$0xff] }
  0xa3   : > { %3918 = vmatprep.mubr.msk.f32.mxu0 %vm423_vm0, %v5178_v63  ;;  %4345 = vmatpush3.bf16.msra.mxu0 %v4342_v32  ;;  %v4354_v63 = vpack.c.bf16 %v1958_v8, %v1957_v60 }
  0xa4   : > { %4347 = vmatprep.subr.bf16.mxu0 %v4346_v45 }
  0xa6   : > { %3919 = vmatmul.mubr.msk.f32.gmra.mrb[4].mxu0 %vm423_vm0, %v5181_v0  ;;  %v1960_v0 = vld [vmem:[%s5940_s6 + $0x58] sm:$0xff] }
  0xa7   : > { %3921 = vmatprep.mubr.msk.f32.mxu0 %vm423_vm0, %v5194_v1  ;;  %4349 = vmatpush3.bf16.msra.mxu0 %v4346_v45  ;;  %v3344_v1 = vld [vmem:[%s5940_s6 + $0x150] sm:$0xff]  ;;  %v4358_v10 = vpack.c.bf16 %v1960_v0, %v1959_v9 }
  0xa8   : > { %4351 = vmatprep.subr.bf16.mxu0 %v4350_v55  ;;  %v4422_v14 = vpack.c.bf16 %v3345_v11, %v3344_v1  ;;  %v3324_v9 = vld [vmem:[%s5940_s6 + $0xb0] sm:$0xff]  ;;  %v3325_v11 = vld [vmem:[%s5940_s6 + $0xb8] sm:$0xff] }
  0xa9   : > { %v4382_v16 = vpack.c.bf16 %v3325_v11, %v3324_v9  ;;  %v3373_v9 = vld [vmem:[%s5940_s6 + $0x238] sm:$0xff] }
  0xaa   : > { %3922 = vmatmul.mubr.msk.f32.gmra.mrb[6].mxu0 %vm423_vm0, %v3304_v61  ;;  %4423 = vmatprep.subr.bf16.mxu1 %v4422_v14  ;;  %v4378_v61 = vpack.c.bf16 %v3323_v27, %v3322_v26 }
  0xab   : > { %4353 = vmatpush3.bf16.msra.mxu0 %v4350_v55  ;;  %4425 = vmatpush3.bf16.msra.mxu1 %v4422_v14  ;;  %v3356_v14 = vld [vmem:[%s5940_s6 + $0x1b0] sm:$0xff] }
  0xac   : > { %4355 = vmatprep.subr.bf16.mxu0 %v4354_v63  ;;  %3956 = vmatprep.mubr.f32.mxu0 %v4878_v28  ;;  %v4446_v29 = vpack.c.bf16 %v3357_v15, %v3356_v14  ;;  %v3374_v14 = vld [vmem:[%s5940_s6 + $0x240] sm:$0xff]  ;;  %v3375_v15 = vld [vmem:[%s5940_s6 + $0x248] sm:$0xff] }
  0xad   : > { %4427 = vmatprep.subr.bf16.mxu1 %v4426_v25 }
  0xaf   : > { %4357 = vmatpush3.bf16.msra.mxu0 %v4354_v63  ;;  %4429 = vmatpush3.bf16.msra.mxu1 %v4426_v25  ;;  %v4442_v63 = vpack.c.bf16 %v3355_v52, %v3354_v31  ;;  %v3371_v52 = vld [vmem:[%s5940_s6 + $0x228] sm:$0xff] }
  0xb0   : > { %4359 = vmatprep.subr.bf16.mxu0 %v4358_v10  ;;  %4431 = vmatprep.subr.bf16.mxu1 %v4430_v36 }
  0xb3   : > { %4361 = vmatpush3.bf16.msra.mxu0 %v4358_v10  ;;  %4433 = vmatpush3.bf16.msra.mxu1 %v4430_v36  ;;  %v4450_v36 = vpack.c.bf16 %v3359_v30, %v3358_v24  ;;  %v3379_v24 = vld [vmem:[%s5940_s6 + $0x268] sm:$0xff]  ;;  %v3380_v30 = vld [vmem:[%s5940_s6 + $0x270] sm:$0xff] }
  0xb4   : > { %4363 = vmatprep.subr.bf16.mxu0 %v4362_v23  ;;  %4435 = vmatprep.subr.bf16.mxu1 %v4434_v46 }
  0xb7   : > { %4365 = vmatpush3.bf16.msra.mxu0 %v4362_v23  ;;  %v3327_v23 = vld [vmem:[%s5940_s6 + $0xc8] sm:$0xff] }
  0xb8   : > { %4367 = vmatprep.subr.bf16.mxu0 %v4366_v34  ;;  %v4386_v35 = vpack.c.bf16 %v3327_v23, %v3326_v19  ;;  %v3376_v19 = vld [vmem:[%s5940_s6 + $0x250] sm:$0xff]  ;;  %v3378_v23 = vld [vmem:[%s5940_s6 + $0x260] sm:$0xff] }
  0xbb   : > { %4369 = vmatpush3.bf16.msra.mxu0 %v4366_v34 }
  0xbc   : > { %4371 = vmatprep.subr.bf16.mxu0 %v4370_v41 }
 0x171   : > { %v3914_v48 = vpop.f32.mrb[0].mxu0 }
 0x172   : > { %v4626_v49 = vadd.f32 %v3914_v48, %v3188_v47  ;;  %v1828_v50 = vpop.f32.mrb[1].mxu0  ;;  %v3362_v48 = vld [vmem:[%s5940_s6 + $0x1e0] sm:$0xff] }
 0x173   : > { %v5429_v51 = vadd.f32 %v3188_v47, %v1828_v50 }
 0x174   : > { %1900 = vst [vmem:[%s5431_s21 + $0x8] sm:$0xff] %v4626_v49  ;;  %v5434_v53 = vmax.f32 %v4626_v49, 0.0  ;;  %v3363_v49 = vld [vmem:[%s5940_s6 + $0x1e8] sm:$0xff] }
 0x175   : > { %1899 = vst [vmem:[%s5431_s21] sm:$0xff] %v5429_v51  ;;  %v1907_v54 = vmax.f32 %v5429_v51, 0.0  ;;  %v3917_v56 = vpop.f32.mrb[2].mxu0  ;;  %v3377_v51 = vld [vmem:[%s5940_s6 + $0x258] sm:$0xff] }
 0x176   : > { %1940 = vst [vmem:[#allocation4 + $0x61] sm:$0xff] %v5434_v53  ;;  %v4628_v57 = vadd.f32 %v3917_v56, %v3188_v47  ;;  %v1838_v58 = vpop.f32.mrb[3].mxu0  ;;  %v4458_v56 = vpack.c.bf16 %v3363_v49, %v3362_v48  ;;  %v3389_v48 = vld [vmem:[%s5940_s6 + $0x2b8] sm:$0xff] }
 0x177   : > { %1935 = vst [vmem:[#allocation4 + $0x1] sm:$0xff] %v1907_v54  ;;  %v5442_v59 = vadd.f32 %v3188_v47, %v1838_v58  ;;  %v3333_v58 = vld [vmem:[%s5940_s6 + $0xf8] sm:$0xff] }
 0x178   : > { %1902 = vst [vmem:[%s5431_s21 + $0x18] sm:$0xff] %v4628_v57  ;;  %v5445_v62 = vmax.f32 %v4628_v57, 0.0  ;;  %v3332_v57 = vld [vmem:[%s5940_s6 + $0xf0] sm:$0xff] }
 0x179   : > { %1901 = vst [vmem:[%s5431_s21 + $0x10] sm:$0xff] %v5442_v59  ;;  %v1909_v3 = vmax.f32 %v5442_v59, 0.0  ;;  %v3920_v4 = vpop.f32.mrb[4].mxu0  ;;  %v4398_v5 = vpack.c.bf16 %v3333_v58, %v3332_v57  ;;  %v3395_v57 = vld [vmem:[%s5940_s6 + $0x2e8] sm:$0xff] }
 0x17a   : > { %1941 = vst [vmem:[#allocation4 + $0x71] sm:$0xff] %v5445_v62  ;;  %v4630_v13 = vadd.f32 %v3920_v4, %v3188_v47  ;;  %v1848_v17 = vpop.f32.mrb[5].mxu0  ;;  %v3365_v4 = vld [vmem:[%s5940_s6 + $0x1f8] sm:$0xff] }
 0x17b   : > { %1936 = vst [vmem:[#allocation4 + $0x11] sm:$0xff] %v1909_v3  ;;  %v5465_v18 = vadd.f32 %v3188_v47, %v1848_v17  ;;  %v4462_v6 = vpack.c.bf16 %v3365_v4, %v3364_v2  ;;  %v3396_v2 = vld [vmem:[%s5940_s6 + $0x2f0] sm:$0xff]  ;;  %v3397_v4 = vld [vmem:[%s5940_s6 + $0x2f8] sm:$0xff] }
 0x17c   : > { %1904 = vst [vmem:[%s5431_s21 + $0x28] sm:$0xff] %v4630_v13  ;;  %v5468_v20 = vmax.f32 %v4630_v13, 0.0  ;;  %v3367_v13 = vld [vmem:[%s5940_s6 + $0x208] sm:$0xff] }
 0x17d   : > { %1903 = vst [vmem:[%s5431_s21 + $0x20] sm:$0xff] %v5465_v18  ;;  %v1911_v32 = vmax.f32 %v5465_v18, 0.0  ;;  %v3923_v39 = vpop.f32.mrb[6].mxu0  ;;  %v5482_v43 = vld [vmem:[#allocation4 + $0x60] sm:$0xff]  ;;  %v4466_v17 = vpack.c.bf16 %v3367_v13, %v3366_v12  ;;  %v3391_v18 = vld [vmem:[%s5940_s6 + $0x2c8] sm:$0xff] }
 0x17e   : > { %v5484_v45 = vld [vmem:[#allocation4 + $0x62] sm:$0xff]  ;;  %1942 = vst [vmem:[#allocation4 + $0x81] sm:$0xff] %v5468_v20  ;;  %v5490_v7 = vadd.f32 %v3923_v39, %v3188_v47  ;;  %v1858_v55 = vpop.f32.mrb[7].mxu0  ;;  %3957 = vmatmul.mubr.f32.vlgmr.msra.gmra.mrb[8].mxu0 %v5482_v43 }
 0x17f   : > { %4033 = vmatmul.mubr.f32.vlgmr.msra.gmra.mrb[0].mxu1 %v5484_v45  ;;  %1937 = vst [vmem:[#allocation4 + $0x21] sm:$0xff] %v1911_v32  ;;  %v5496_v60 = vadd.f32 %v3188_v47, %v1858_v55  ;;  %4373 = vmatpush3.bf16.msra.mxu0 %v4370_v41  ;;  %v2297_v34 = vld [vmem:[#allocation4] sm:$0xff]  ;;  %v3361_v41 = vld [vmem:[%s5940_s6 + $0x1d8] sm:$0xff]  ;;  %v3331_v47 = vld [vmem:[%s5940_s6 + $0xe8] sm:$0xff] }
 0x180   : > { %4437 = vmatpush3.bf16.msra.mxu1 %v4434_v46  ;;  %1906 = vst [vmem:[%s5431_s21 + $0x38] sm:$0xff] %v5490_v7  ;;  %v1914_v8 = vmax.f32 %v5490_v7, 0.0  ;;  %4375 = vmatprep.subr.bf16.mxu0 %v4374_v21  ;;  %v4454_v44 = vpack.c.bf16 %v3361_v41, %v3360_v40  ;;  %v3330_v46 = vld [vmem:[%s5940_s6 + $0xe0] sm:$0xff]  ;;  %v3385_v40 = vld [vmem:[%s5940_s6 + $0x298] sm:$0xff]  ;;  %v3399_v12 = vld [vmem:[%s5940_s6 + $0x308] sm:$0xff] }
 0x181   : > { %4439 = vmatprep.subr.bf16.mxu1 %v4438_v22  ;;  %1905 = vst [vmem:[%s5431_s21 + $0x30] sm:$0xff] %v5496_v60  ;;  %v1913_v0 = vmax.f32 %v5496_v60, 0.0  ;;  %v5507_v1 = vld [vmem:[#allocation4 + $0x70] sm:$0xff]  ;;  %v4394_v50 = vpack.c.bf16 %v3331_v47, %v3330_v46  ;;  %v3370_v39 = vld [vmem:[%s5940_s6 + $0x220] sm:$0xff]  ;;  %v4502_v41 = vpack.c.bf16 %v3385_v40, %v3384_v38  ;;  %s4788_s21 = scalar_lea.vmem %s4787_s22, 2048 }
 0x182   : > { %v5509_v10 = vld [vmem:[#allocation4 + $0x72] sm:$0xff]  ;;  %1943 = vst [vmem:[#allocation4 + $0x91] sm:$0xff] %v1914_v8  ;;  %3959 = vmatprep.mubr.f32.mxu0 %v5507_v1  ;;  %v2533_v49 = vld [vmem:[#allocation4 + $0x2] sm:$0xff]  ;;  %p4790_p1 = scmp.lt.s32.totalorder %s4788_s21, %s4782_s24 }
 0x183   : > { %4035 = vmatprep.mubr.f32.mxu1 %v5509_v10  ;;  %1938 = vst [vmem:[#allocation4 + $0x31] sm:$0xff] %v1913_v0  ;;  %4377 = vmatpush3.bf16.msra.mxu0 %v4374_v21  ;;  %v3368_v21 = vld [vmem:[%s5940_s6 + $0x210] sm:$0xff]  ;;  %v3418_v40 = vld [vmem:[%s5940_s6 + $0x3a0] sm:$0xff] }
 0x184   : > { %4441 = vmatpush3.bf16.msra.mxu1 %v4438_v22  ;;  %4379 = vmatprep.subr.bf16.mxu0 %v4378_v61  ;;  %v3369_v22 = vld [vmem:[%s5940_s6 + $0x218] sm:$0xff]  ;;  %v2298_v26 = vld [vmem:[#allocation4 + $0x10] sm:$0xff]  ;;  %p4791_p2 = por %p4790_p1, %p4789_p0 }
 0x185   : > { %4443 = vmatprep.subr.bf16.mxu1 %v4442_v63  ;;  %v5535_v25 = vld [vmem:[#allocation4 + $0x80] sm:$0xff]  ;;  %v4470_v27 = vpack.c.bf16 %v3369_v22, %v3368_v21  ;;  %v3388_v47 = vld [vmem:[%s5940_s6 + $0x2b0] sm:$0xff]  ;;  %v3401_v21 = vld [vmem:[%s5940_s6 + $0x318] sm:$0xff] }
 0x186   : > { %v5537_v28 = vld [vmem:[#allocation4 + $0x82] sm:$0xff]  ;;  %3960 = vmatmul.mubr.f32.gmra.mrb[10].mxu0 %v5535_v25  ;;  %v4510_v59 = vpack.c.bf16 %v3389_v48, %v3388_v47  ;;  %v3392_v60 = vld [vmem:[%s5940_s6 + $0x2d0] sm:$0xff]  ;;  %v3421_v47 = vld [vmem:[%s5940_s6 + $0x3b8] sm:$0xff]  ;;  %p4792_p3 = pnand %p4791_p2, %p4785_p13 }
 0x187   : > { %4036 = vmatmul.mubr.f32.gmra.mrb[2].mxu1 %v5537_v28  ;;  %4381 = vmatpush3.bf16.msra.mxu0 %v4378_v61  ;;  %v2299_v31 = vld [vmem:[#allocation4 + $0x20] sm:$0xff]  ;;  %v4474_v61 = vpack.c.bf16 %v3371_v52, %v3370_v39  ;;  %v3423_v48 = vld [vmem:[%s5940_s6 + $0x3c8] sm:$0xff]  ;;  %v3440_v7 = vld [vmem:[%s5940_s6 + $0x450] sm:$0xff] }
 0x188   : > { %4445 = vmatpush3.bf16.msra.mxu1 %v4442_v63  ;;  %4070 = vmatprep.mubr.f32.mxu1 %v2297_v34  ;;  %v3372_v63 = vld [vmem:[%s5940_s6 + $0x230] sm:$0xff]  ;;  %v2535_v39 = vld [vmem:[#allocation4 + $0x22] sm:$0xff] }
 0x189   : > { %4383 = vmatprep.subr.bf16.mxu0 %v4382_v16  ;;  %4447 = vmatprep.subr.bf16.mxu1 %v4446_v29  ;;  %v4478_v11 = vpack.c.bf16 %v3373_v9, %v3372_v63  ;;  %v3405_v63 = vld [vmem:[%s5940_s6 + $0x338] sm:$0xff] }
 0x18a   : > { %3994 = vmatprep.mubr.f32.mxu0 %v2061_v33  ;;  %v2300_v55 = vld [vmem:[#allocation4 + $0x30] sm:$0xff]  ;;  %v3381_v33 = vld [vmem:[%s5940_s6 + $0x278] sm:$0xff] }
 0x18b   : > { %4385 = vmatpush3.bf16.msra.mxu0 %v4382_v16  ;;  %v4482_v16 = vpack.c.bf16 %v3375_v15, %v3374_v14  ;;  %v4494_v34 = vpack.c.bf16 %v3381_v33, %v3380_v30  ;;  %v3407_v14 = vld [vmem:[%s5940_s6 + $0x348] sm:$0xff]  ;;  %v3414_v33 = vld [vmem:[%s5940_s6 + $0x380] sm:$0xff] }
 0x18c   : > { %4449 = vmatpush3.bf16.msra.mxu1 %v4446_v29  ;;  %4387 = vmatprep.subr.bf16.mxu0 %v4386_v35  ;;  %v4490_v29 = vpack.c.bf16 %v3379_v24, %v3378_v23  ;;  %v3412_v24 = vld [vmem:[%s5940_s6 + $0x370] sm:$0xff] }
 0x18d   : > { %4451 = vmatprep.subr.bf16.mxu1 %v4450_v36 }
 0x18f   : > { %4389 = vmatpush3.bf16.msra.mxu0 %v4386_v35  ;;  %v3382_v35 = vld [vmem:[%s5940_s6 + $0x280] sm:$0xff] }
 0x190   : > { %4453 = vmatpush3.bf16.msra.mxu1 %v4450_v36  ;;  %4391 = vmatprep.subr.bf16.mxu0 %v4390_v42  ;;  %v3383_v36 = vld [vmem:[%s5940_s6 + $0x288] sm:$0xff] }
 0x191   : > { %4455 = vmatprep.subr.bf16.mxu1 %v4454_v44  ;;  %v4498_v37 = vpack.c.bf16 %v3383_v36, %v3382_v35  ;;  %v3416_v36 = vld [vmem:[%s5940_s6 + $0x390] sm:$0xff] }
 0x193   : > { %4393 = vmatpush3.bf16.msra.mxu0 %v4390_v42  ;;  %v3386_v42 = vld [vmem:[%s5940_s6 + $0x2a0] sm:$0xff] }
 0x194   : > { %4457 = vmatpush3.bf16.msra.mxu1 %v4454_v44  ;;  %4395 = vmatprep.subr.bf16.mxu0 %v4394_v50  ;;  %v3387_v44 = vld [vmem:[%s5940_s6 + $0x2a8] sm:$0xff] }
 0x195   : > { %4459 = vmatprep.subr.bf16.mxu1 %v4458_v56  ;;  %v4506_v46 = vpack.c.bf16 %v3387_v44, %v3386_v42  ;;  %v2654_v44 = vld [vmem:[#allocation4 + $0x90] sm:$0xff] }
 0x197   : > { %4397 = vmatpush3.bf16.msra.mxu0 %v4394_v50 }
 0x198   : > { %4461 = vmatpush3.bf16.msra.mxu1 %v4458_v56  ;;  %4399 = vmatprep.subr.bf16.mxu0 %v4398_v5  ;;  %v3394_v56 = vld [vmem:[%s5940_s6 + $0x2e0] sm:$0xff] }
 0x199   : > { %4463 = vmatprep.subr.bf16.mxu1 %v4462_v6  ;;  %v4522_v58 = vpack.c.bf16 %v3395_v57, %v3394_v56  ;;  %v3430_v57 = vld [vmem:[%s5940_s6 + $0x400] sm:$0xff] }
 0x19b   : > { %4401 = vmatpush3.bf16.msra.mxu0 %v4398_v5  ;;  %v4526_v5 = vpack.c.bf16 %v3397_v4, %v3396_v2  ;;  %v3432_v4 = vld [vmem:[%s5940_s6 + $0x410] sm:$0xff] }
 0x19c   : > { %4465 = vmatpush3.bf16.msra.mxu1 %v4462_v6  ;;  %v3398_v6 = vld [vmem:[%s5940_s6 + $0x300] sm:$0xff] }
 0x19d   : > { %4467 = vmatprep.subr.bf16.mxu1 %v4466_v17  ;;  %v4530_v13 = vpack.c.bf16 %v3399_v12, %v3398_v6  ;;  %v3434_v12 = vld [vmem:[%s5940_s6 + $0x420] sm:$0xff] }
 0x19e   : > { %3995 = vmatmul.mubr.f32.vlgmr.msra.gmra.mrb[8].mxu0 %v5434_v53 }
 0x19f   : > { %4071 = vmatmul.mubr.f32.vlgmr.msra.gmra.mrb[0].mxu1 %v2298_v26  ;;  %3997 = vmatprep.mubr.f32.mxu0 %v5445_v62  ;;  %v2534_v26 = vld [vmem:[#allocation4 + $0x12] sm:$0xff] }
 0x1a0   : > { %4073 = vmatprep.mubr.f32.mxu1 %v2299_v31  ;;  %4469 = vmatpush3.bf16.msra.mxu1 %v4466_v17  ;;  %v3400_v17 = vld [vmem:[%s5940_s6 + $0x310] sm:$0xff]  ;;  %v3403_v31 = vld [vmem:[%s5940_s6 + $0x328] sm:$0xff] }
 0x1a1   : > { %4471 = vmatprep.subr.bf16.mxu1 %v4470_v27  ;;  %v4534_v22 = vpack.c.bf16 %v3401_v21, %v3400_v17  ;;  %v3436_v21 = vld [vmem:[%s5940_s6 + $0x430] sm:$0xff] }
 0x1a2   : > { %3998 = vmatmul.mubr.f32.gmra.mrb[10].mxu0 %v5468_v20 }
 0x1a3   : > { %4074 = vmatmul.mubr.f32.gmra.mrb[2].mxu1 %v2300_v55  ;;  %v2536_v55 = vld [vmem:[#allocation4 + $0x32] sm:$0xff] }
 0x1a4   : > { %4108 = vmatprep.mubr.f32.mxu1 %v1907_v54  ;;  %4473 = vmatpush3.bf16.msra.mxu1 %v4470_v27  ;;  %v4486_v54 = vpack.c.bf16 %v3377_v51, %v3376_v19  ;;  %v3402_v27 = vld [vmem:[%s5940_s6 + $0x320] sm:$0xff] }
 0x1a5   : > { %4475 = vmatprep.subr.bf16.mxu1 %v4474_v61  ;;  %v4538_v52 = vpack.c.bf16 %v3403_v31, %v3402_v27  ;;  %v3410_v51 = vld [vmem:[%s5940_s6 + $0x360] sm:$0xff] }
 0x1a6   : > { %v3442_v31 = vld [vmem:[%s5940_s6 + $0x460] sm:$0xff] }
 0x1a8   : > { %4477 = vmatpush3.bf16.msra.mxu1 %v4474_v61  ;;  %v3404_v61 = vld [vmem:[%s5940_s6 + $0x330] sm:$0xff] }
 0x1a9   : > { %4479 = vmatprep.subr.bf16.mxu1 %v4478_v11  ;;  %v4542_v9 = vpack.c.bf16 %v3405_v63, %v3404_v61  ;;  %v3445_v61 = vld [vmem:[%s5940_s6 + $0x478] sm:$0xff] }
 0x1ac   : > { %4481 = vmatpush3.bf16.msra.mxu1 %v4478_v11  ;;  %v3406_v11 = vld [vmem:[%s5940_s6 + $0x340] sm:$0xff] }
 0x1ad   : > { %4483 = vmatprep.subr.bf16.mxu1 %v4482_v16  ;;  %v4546_v15 = vpack.c.bf16 %v3407_v14, %v3406_v11 }
 0x1b0   : > { %4485 = vmatpush3.bf16.msra.mxu1 %v4482_v16  ;;  %v3408_v16 = vld [vmem:[%s5940_s6 + $0x350] sm:$0xff] }
 0x1b1   : > { %4487 = vmatprep.subr.bf16.mxu1 %v4486_v54 }
 0x1b4   : > { %4489 = vmatpush3.bf16.msra.mxu1 %v4486_v54  ;;  %v3411_v54 = vld [vmem:[%s5940_s6 + $0x368] sm:$0xff] }
 0x1b5   : > { %4491 = vmatprep.subr.bf16.mxu1 %v4490_v29  ;;  %v4554_v23 = vpack.c.bf16 %v3411_v54, %v3410_v51 }
 0x1b8   : > { %4493 = vmatpush3.bf16.msra.mxu1 %v4490_v29  ;;  %v3413_v29 = vld [vmem:[%s5940_s6 + $0x378] sm:$0xff] }
 0x1b9   : > { %4495 = vmatprep.subr.bf16.mxu1 %v4494_v34  ;;  %v4558_v30 = vpack.c.bf16 %v3413_v29, %v3412_v24 }
 0x1bc   : > { %4497 = vmatpush3.bf16.msra.mxu1 %v4494_v34  ;;  %v3415_v34 = vld [vmem:[%s5940_s6 + $0x388] sm:$0xff] }
 0x1bd   : > { %4499 = vmatprep.subr.bf16.mxu1 %v4498_v37  ;;  %v4562_v35 = vpack.c.bf16 %v3415_v34, %v3414_v33 }
 0x1bf   : > { %4109 = vmatmul.mubr.f32.vlgmr.msra.gmra.mrb[0].mxu1 %v1909_v3  ;;  %v3390_v3 = vld [vmem:[%s5940_s6 + $0x2c0] sm:$0xff] }
 0x1c0   : > { %4111 = vmatprep.mubr.f32.mxu1 %v1911_v32  ;;  %4501 = vmatpush3.bf16.msra.mxu1 %v4498_v37  ;;  %v4514_v32 = vpack.c.bf16 %v3391_v18, %v3390_v3  ;;  %v3417_v37 = vld [vmem:[%s5940_s6 + $0x398] sm:$0xff]  ;;  %v3426_v18 = vld [vmem:[%s5940_s6 + $0x3e0] sm:$0xff] }
 0x1c1   : > { %4503 = vmatprep.subr.bf16.mxu1 %v4502_v41  ;;  %v4566_v38 = vpack.c.bf16 %v3417_v37, %v3416_v36 }
 0x1c3   : > { %4112 = vmatmul.mubr.f32.gmra.mrb[2].mxu1 %v1913_v0  ;;  %v3393_v0 = vld [vmem:[%s5940_s6 + $0x2d8] sm:$0xff] }
 0x1c4   : > { %4505 = vmatpush3.bf16.msra.mxu1 %v4502_v41  ;;  %4146 = vmatprep.mubr.f32.mxu1 %v2533_v49  ;;  %v4518_v50 = vpack.c.bf16 %v3393_v0, %v3392_v60  ;;  %v3419_v41 = vld [vmem:[%s5940_s6 + $0x3a8] sm:$0xff]  ;;  %v3428_v0 = vld [vmem:[%s5940_s6 + $0x3f0] sm:$0xff] }
 0x1c5   : > { %4507 = vmatprep.subr.bf16.mxu1 %v4506_v46  ;;  %v4570_v42 = vpack.c.bf16 %v3419_v41, %v3418_v40 }
 0x1c8   : > { %4509 = vmatpush3.bf16.msra.mxu1 %v4506_v46  ;;  %v3420_v46 = vld [vmem:[%s5940_s6 + $0x3b0] sm:$0xff] }
 0x1c9   : > { %4511 = vmatprep.subr.bf16.mxu1 %v4510_v59 }
 0x1cc   : > { %4513 = vmatpush3.bf16.msra.mxu1 %v4510_v59  ;;  %v3424_v59 = vld [vmem:[%s5940_s6 + $0x3d0] sm:$0xff] }
 0x1cd   : > { %4515 = vmatprep.subr.bf16.mxu1 %v4514_v32 }
 0x1d0   : > { %4517 = vmatpush3.bf16.msra.mxu1 %v4514_v32  ;;  %v3427_v32 = vld [vmem:[%s5940_s6 + $0x3e8] sm:$0xff] }
 0x1d1   : > { %4519 = vmatprep.subr.bf16.mxu1 %v4518_v50  ;;  %v4586_v60 = vpack.c.bf16 %v3427_v32, %v3426_v18 }
 0x1d4   : > { %4521 = vmatpush3.bf16.msra.mxu1 %v4518_v50  ;;  %v3429_v50 = vld [vmem:[%s5940_s6 + $0x3f8] sm:$0xff] }
 0x1d5   : > { %4523 = vmatprep.subr.bf16.mxu1 %v4522_v58  ;;  %v4590_v56 = vpack.c.bf16 %v3429_v50, %v3428_v0 }
 0x1d8   : > { %4525 = vmatpush3.bf16.msra.mxu1 %v4522_v58  ;;  %v3431_v58 = vld [vmem:[%s5940_s6 + $0x408] sm:$0xff] }
 0x1d9   : > { %4527 = vmatprep.subr.bf16.mxu1 %v4526_v5  ;;  %v4594_v2 = vpack.c.bf16 %v3431_v58, %v3430_v57 }
 0x1dc   : > { %4529 = vmatpush3.bf16.msra.mxu1 %v4526_v5  ;;  %v3433_v5 = vld [vmem:[%s5940_s6 + $0x418] sm:$0xff] }
 0x1dd   : > { %4531 = vmatprep.subr.bf16.mxu1 %v4530_v13  ;;  %v4598_v6 = vpack.c.bf16 %v3433_v5, %v3432_v4 }
 0x1df   : > { %4147 = vmatmul.mubr.f32.vlgmr.msra.gmra.mrb[0].mxu1 %v2534_v26  ;;  %v3439_v26 = vld [vmem:[%s5940_s6 + $0x448] sm:$0xff] }
 0x1e0   : > { %4149 = vmatprep.mubr.f32.mxu1 %v2535_v39  ;;  %4533 = vmatpush3.bf16.msra.mxu1 %v4530_v13  ;;  %v3435_v13 = vld [vmem:[%s5940_s6 + $0x428] sm:$0xff] }
 0x1e1   : > { %4535 = vmatprep.subr.bf16.mxu1 %v4534_v22  ;;  %v4602_v17 = vpack.c.bf16 %v3435_v13, %v3434_v12  ;;  %v3443_v39 = vld [vmem:[%s5940_s6 + $0x468] sm:$0xff] }
 0x1e3   : > { %4150 = vmatmul.mubr.f32.gmra.mrb[2].mxu1 %v2536_v55  ;;  %v3444_v55 = vld [vmem:[%s5940_s6 + $0x470] sm:$0xff] }
 0x1e4   : > { %4537 = vmatpush3.bf16.msra.mxu1 %v4534_v22  ;;  %4184 = vmatprep.mubr.f32.mxu1 %v5482_v43  ;;  %v3409_v43 = vld [vmem:[%s5940_s6 + $0x358] sm:$0xff]  ;;  %v4622_v63 = vpack.c.bf16 %v3445_v61, %v3444_v55 }
 0x1e5   : > { %4539 = vmatprep.subr.bf16.mxu1 %v4538_v52  ;;  %v4550_v19 = vpack.c.bf16 %v3409_v43, %v3408_v16  ;;  %v3437_v22 = vld [vmem:[%s5940_s6 + $0x438] sm:$0xff] }
 0x1e8   : > { %4541 = vmatpush3.bf16.msra.mxu1 %v4538_v52  ;;  %v4618_v52 = vpack.c.bf16 %v3443_v39, %v3442_v31 }
 0x1e9   : > { %4543 = vmatprep.subr.bf16.mxu1 %v4542_v9 }
 0x1ec   : > { %4545 = vmatpush3.bf16.msra.mxu1 %v4542_v9  ;;  %v2890_v9 = vld [vmem:[#allocation4 + $0x92] sm:$0xff] }
 0x1ed   : > { %4547 = vmatprep.subr.bf16.mxu1 %v4546_v15 }
 0x1f0   : > { %4549 = vmatpush3.bf16.msra.mxu1 %v4546_v15 }
 0x1f1   : > { %4551 = vmatprep.subr.bf16.mxu1 %v4550_v19 }
 0x1f4   : > { %4553 = vmatpush3.bf16.msra.mxu1 %v4550_v19 }
 0x1f5   : > { %4555 = vmatprep.subr.bf16.mxu1 %v4554_v23 }
 0x1f8   : > { %4557 = vmatpush3.bf16.msra.mxu1 %v4554_v23 }
 0x1f9   : > { %4559 = vmatprep.subr.bf16.mxu1 %v4558_v30 }
 0x1fc   : > { %4561 = vmatpush3.bf16.msra.mxu1 %v4558_v30 }
 0x1fd   : > { %4563 = vmatprep.subr.bf16.mxu1 %v4562_v35 }
 0x1ff   : > { %4185 = vmatmul.mubr.f32.vlgmr.msra.gmra.mrb[0].mxu1 %v5507_v1  ;;  %v4574_v1 = vpack.c.bf16 %v3421_v47, %v3420_v46 }
 0x200   : > { %4187 = vmatprep.mubr.f32.mxu1 %v5535_v25  ;;  %4565 = vmatpush3.bf16.msra.mxu1 %v4562_v35  ;;  %v3422_v25 = vld [vmem:[%s5940_s6 + $0x3c0] sm:$0xff] }
 0x201   : > { %4567 = vmatprep.subr.bf16.mxu1 %v4566_v38  ;;  %v4578_v49 = vpack.c.bf16 %v3423_v48, %v3422_v25 }
 0x203   : > { %4188 = vmatmul.mubr.f32.gmra.mrb[2].mxu1 %v2654_v44 }
 0x204   : > { %4569 = vmatpush3.bf16.msra.mxu1 %v4566_v38  ;;  %4222 = vmatprep.mubr.f32.mxu1 %v5434_v53  ;;  %v3425_v53 = vld [vmem:[%s5940_s6 + $0x3d8] sm:$0xff] }
 0x205   : > { %4571 = vmatprep.subr.bf16.mxu1 %v4570_v42  ;;  %v4582_v3 = vpack.c.bf16 %v3425_v53, %v3424_v59 }
 0x208   : > { %4573 = vmatpush3.bf16.msra.mxu1 %v4570_v42 }
 0x209   : > { %4575 = vmatprep.subr.bf16.mxu1 %v4574_v1 }
 0x20c   : > { %4577 = vmatpush3.bf16.msra.mxu1 %v4574_v1 }
 0x20d   : > { %4579 = vmatprep.subr.bf16.mxu1 %v4578_v49 }
 0x210   : > { %4581 = vmatpush3.bf16.msra.mxu1 %v4578_v49 }
 0x211   : > { %4583 = vmatprep.subr.bf16.mxu1 %v4582_v3 }
 0x214   : > { %4585 = vmatpush3.bf16.msra.mxu1 %v4582_v3 }
 0x215   : > { %4587 = vmatprep.subr.bf16.mxu1 %v4586_v60 }
 0x218   : > { %4589 = vmatpush3.bf16.msra.mxu1 %v4586_v60 }
 0x219   : > { %4591 = vmatprep.subr.bf16.mxu1 %v4590_v56 }
 0x21c   : > { %4593 = vmatpush3.bf16.msra.mxu1 %v4590_v56 }
 0x21d   : > { %4595 = vmatprep.subr.bf16.mxu1 %v4594_v2 }
 0x21f   : > { %4223 = vmatmul.mubr.f32.vlgmr.msra.gmra.mrb[0].mxu1 %v5445_v62  ;;  %v4606_v62 = vpack.c.bf16 %v3437_v22, %v3436_v21 }
 0x220   : > { %4225 = vmatprep.mubr.f32.mxu1 %v5468_v20  ;;  %4597 = vmatpush3.bf16.msra.mxu1 %v4594_v2  ;;  %v3438_v20 = vld [vmem:[%s5940_s6 + $0x440] sm:$0xff] }
 0x221   : > { %4599 = vmatprep.subr.bf16.mxu1 %v4598_v6  ;;  %v4610_v27 = vpack.c.bf16 %v3439_v26, %v3438_v20 }
 0x223   : > { %4226 = vmatmul.mubr.f32.gmra.mrb[2].mxu1 %v1914_v8 }
 0x224   : > { %4601 = vmatpush3.bf16.msra.mxu1 %v4598_v6  ;;  %4260 = vmatprep.mubr.f32.mxu1 %v5484_v45  ;;  %v3441_v45 = vld [vmem:[%s5940_s6 + $0x458] sm:$0xff] }
 0x225   : > { %4603 = vmatprep.subr.bf16.mxu1 %v4602_v17  ;;  %v4614_v8 = vpack.c.bf16 %v3441_v45, %v3440_v7 }
 0x228   : > { %4605 = vmatpush3.bf16.msra.mxu1 %v4602_v17 }
 0x229   : > { %4607 = vmatprep.subr.bf16.mxu1 %v4606_v62 }
 0x22c   : > { %4609 = vmatpush3.bf16.msra.mxu1 %v4606_v62 }
 0x22d   : > { %4611 = vmatprep.subr.bf16.mxu1 %v4610_v27 }
 0x230   : > { %4613 = vmatpush3.bf16.msra.mxu1 %v4610_v27 }
 0x231   : > { %4615 = vmatprep.subr.bf16.mxu1 %v4614_v8 }
 0x234   : > { %4617 = vmatpush3.bf16.msra.mxu1 %v4614_v8 }
 0x235   : > { %4619 = vmatprep.subr.bf16.mxu1 %v4618_v52 }
 0x238   : > { %4621 = vmatpush3.bf16.msra.mxu1 %v4618_v52 }
 0x239   : > { %4623 = vmatprep.subr.bf16.mxu1 %v4622_v63 }
 0x23c   : > { %4625 = vmatpush3.bf16.msra.mxu1 %v4622_v63 }
 0x23f   : > { %4261 = vmatmul.mubr.f32.vlgmr.msra.gmra.mrb[0].mxu1 %v5509_v10 }
 0x240   : > { %4263 = vmatprep.mubr.f32.mxu1 %v5537_v28 }
 0x243   : > { %4264 = vmatmul.mubr.f32.gmra.mrb[2].mxu1 %v2890_v9 }
 0x271   : > { %v3996_v11 = vpop.f32.mrb[8].mxu0 }
 0x272   : > { %v2148_v14 = vpop.f32.mrb[9].mxu0 }
 0x275   : > { %v3999_v15 = vpop.f32.mrb[10].mxu0 }
 0x276   : > { %v2158_v16 = vpop.f32.mrb[11].mxu0 }
 0x277   : > { %4795 = shalt.err (!%p4792_p3)
}
 0x278   : > { %s4796_s25 = scalar_lea.hbm %s5847_s23, 1024  ;;  %s4800_s16 = scalar_lea.hbm %s5942_s8, 2048 }
 0x279   : > { %p4797_p4 = scmp.ne.s32.totalorder %s5847_s23, %s4796_s25  ;;  %p4801_p9 = scmp.lt.u32.totalorder %s5847_s23, %s5942_s8 }
 0x27a   : > { %p4802_p10 = scmp.lt.u32.totalorder %s4800_s16, %s4796_s25  ;;  %p4804_p12 = scmp.lt.u32.totalorder %s4796_s25, %s5847_s23 }
 0x27b   : > { %p4798_p7 = pnand %p4797_p4, %p4971_p5 }
 0x27c   : > { %p4803_p11 = por %p4802_p10, %p4801_p9 }
 0x27d   : > { %p4799_p8 = pneg %p4798_p7 }
 0x27e   : > { %p4805_p13 = por %p4804_p12, %p4803_p11 }
 0x280   : > { %p4806_p0 = pnand %p4805_p13, %p4799_p8 }
 0x282   : > { %4809 = shalt.err (!%p4806_p0)
}
 0x283   : > { %s5944_s24 = smov 128   ;;  %s4881_s21 = smov 8   ;;  %v3317_v10 = vld [vmem:[%s5941_s7] ss:$0 sm:$0xff] }
 0x284   : > { %4735 = dma.vmem_to_hbm [thread:$0]  (%p4971_p5), %s5849_s28, 1024, %s5847_s23, %s3014_s26, %s5944_s24, %s5944_s24, %s4881_s21   ;;  %v4634_v28 = vadd.f32 %v3996_v11, %v3317_v10  ;;  %v4636_v43 = vadd.f32 %v3317_v10, %v2148_v14  ;;  %v4638_v24 = vadd.f32 %v3999_v15, %v3317_v10  ;;  %v4640_v29 = vadd.f32 %v3317_v10, %v2158_v16 }
 0x285   : > { %s3183_s25 = sshll.u32 %s5423_s17, 5  ;;  %s3455_s22 = sshll.u32 %s4954_s13, 9 }
 0x286   : > { %s381_s16 = scalar_lea.vmem [#allocation7], %s3183_s25  ;;  %s5888_s26 = scalar_lea.hbm %s5943_s9, %s3455_s22 }
 0x287   : > { %s3048_s27 = sshll.u32 %s381_s16, 4  ;;  %s3019_s29 = scalar_lea.sflag [#allocation8], %s5423_s17  ;;  %s5883_s27 = int_to_ptr.vmem [resolvable:$true] %s3048_s27 }
 0x288   : > { %s4810_s13 = scalar_lea.vmem %s5883_s27, 512  ;;  %s4882_s14 = smov [#allocation7]  }
 0x289   : > { %p4811_p1 = scmp.ne.s32.totalorder %s5883_s27, %s4810_s13  ;;  %s4814_s25 = sshll.u32 %s4882_s14, 4  ;;  %s4815_s25 = int_to_ptr.vmem [resolvable:$false] %s4814_s25 }
 0x28a   : > { %s4816_s24 = scalar_lea.vmem %s4815_s25, 1024  ;;  %p4817_p4 = scmp.lt.s32.totalorder %s5883_s27, %s4815_s25 }
 0x28b   : > { %p4812_p2 = pnand %p4811_p1, %p4971_p5  ;;  %p4818_p7 = scmp.lt.s32.totalorder %s4816_s24, %s4810_s13 }
 0x28d   : > { %p4813_p3 = pneg %p4812_p2  ;;  %p4819_p8 = por %p4818_p7, %p4817_p4 }
 0x28f   : > { %p4820_p9 = pnand %p4819_p8, %p4813_p3 }
 0x312   : > { %v4262_v19 = vpop.f32.mrb[0].mxu1 }
 0x313   : > { %v4635_v51 = vadd.f32 %v4634_v28, %v4262_v19  ;;  %v2974_v54 = vpop.f32.mrb[1].mxu1 }
 0x314   : > { %v4637_v23 = vadd.f32 %v4636_v43, %v2974_v54 }
 0x315   : > { %3010 = vst [vmem:[%s381_s16 + $0x8] sm:$0xff] %v4635_v51 }
 0x316   : > { %3009 = vst [vmem:[%s381_s16] sm:$0xff] %v4637_v23  ;;  %v4265_v30 = vpop.f32.mrb[2].mxu1 }
 0x317   : > { %v4639_v33 = vadd.f32 %v4638_v24, %v4265_v30  ;;  %v2984_v34 = vpop.f32.mrb[3].mxu1 }
 0x318   : > { %v4641_v35 = vadd.f32 %v4640_v29, %v2984_v34 }
 0x319   : > { %3012 = vst [vmem:[%s381_s16 + $0x18] sm:$0xff] %v4639_v33 }
 0x31a   : > { %3011 = vst [vmem:[%s381_s16 + $0x10] sm:$0xff] %v4641_v35 }
 0x31b   : > { %4823 = shalt.err (!%p4820_p9)
}
 0x31c   : > { %s4824_s16 = scalar_lea.hbm %s5888_s26, 512  ;;  %s4828_s23 = scalar_lea.hbm %s5943_s9, 1024 }
 0x31d   : > { %p4825_p10 = scmp.ne.s32.totalorder %s5888_s26, %s4824_s16  ;;  %p4829_p13 = scmp.lt.u32.totalorder %s5888_s26, %s5943_s9 }
 0x31e   : > { %p4830_p0 = scmp.lt.u32.totalorder %s4828_s23, %s4824_s16  ;;  %p4832_p2 = scmp.lt.u32.totalorder %s4824_s16, %s5888_s26 }
 0x31f   : > { %p4826_p11 = pnand %p4825_p10, %p4971_p5 }
 0x320   : > { %p4831_p1 = por %p4830_p0, %p4829_p13 }
 0x321   : > { %p4827_p12 = pneg %p4826_p11 }
 0x322   : > { %p4833_p3 = por %p4832_p2, %p4831_p1 }
 0x324   : > { %p4834_p4 = pnand %p4833_p3, %p4827_p12 }
 0x326   : > { %4837 = shalt.err (!%p4834_p4)
}
 0x327   : > { %s5947_s24 = smov 128  }
 0x328   : > { %4736 = dma.vmem_to_hbm [thread:$0]  (%p4971_p5), %s5883_s27, 512, %s5888_s26, %s3019_s29, %s5947_s24, %s5947_s24, %s4881_s21  }
 0x329 PF: > { %p4746_p7 = scmp.ge.s32.totalorder %s4876_s12, 2  ;;  %s3063_s13 = sand.u32 1, %s4864_s30  }
 0x32a   : > { %s3064_s16 = scalar_lea.sflag [#allocation6], %s3063_s13 }
 0x32b   : > { %p4740_p8 = pnand %p4746_p7, %p4975_p6 }
 0x32d   : > { %4855 = dma.done.wait (!%p4740_p8), %s3064_s16, 1024  }
 0x32e   : > { %4857 = vsyncadd (!%p4740_p8), %s3064_s16, 4294966272  ;;  %s3073_s19 = scalar_lea.sflag [#allocation8], %s3063_s13 }
 0x32f   : > { %4859 = dma.done.wait (!%p4740_p8), %s3073_s19, 512  }
 0x330   : > { %4861 = vsyncadd (!%p4740_p8), %s3073_s19, 4294966784  ;;  %p23_p5 = scmp.ge.s32.totalorder %s4958_s15, 4   ;;  %s5948_s30 = smov %s4868_s10 }
 0x331   : > { %s5949_s10 = smov %s4872_s11  ;;  %s5950_s11 = smov %s4969_s18 }
 0x332   : > { %s5951_s12 = smov %s4958_s15  ;;  %25 = sbr.rel (!%p23_p5) target bundleno = 5 (0x5), region = 133 }
 0x339   :  { %3078 = vsyncpa [#allocation6], 1 }
 0x33a   :  { %3080 = vsyncpa [#allocation6 + $0x1], 1 }
 0x33b   :  { %3081 = vsyncpa [#allocation8], 1 }
 0x33c   :  { %3083 = vsyncpa [#allocation8 + $0x1], 1 }

</bundles_post_ra>
